<compile_context>
chip_gen: v6e
topology: v6e:2x2x1
jax: 0.10.0
libtpu: 0.0.40
codegen_flags: <defaults>
</compile_context>

<pallas_src>
import functools
import math

import jax
import jax.numpy as jnp
import numpy as np
from jax import lax
from jax.experimental import pallas as pl


# ----------------------------------------------------------------------------
# Kernel: whole encoder in one invocation.  Layout (transposed activation):
#     xT    : (d_model, T)      features on sublanes, tokens on lanes
#     qkvT  : (2*C + Cv, T)     C = dk*nhead, Cv = dv*nhead
#     mhaT  : (d_model, T)
#
# Head scramble bookkeeping (faithful to the PyTorch reshape):
#     Qh[h][t, G*a + b] = qT[b*T + t, h*R + a],   R = T//nhead, G = C//T
# so per head the G blocks qkvT[b*T:(b+1)*T, h*R:(h+1)*R] lane-concatenated
# give a (T, dk) matrix whose columns are a permutation of Qh[h]'s columns —
# identical permutation for Q/K (scores) and for V/wo (perm folded into wo).
# ----------------------------------------------------------------------------
def encoder_kernel(xT_ref, wqkvT_ref, woT_ref, w1T_ref, w2T_ref, vd_ref, vw_ref,
                   outT_ref, *, num_layers, nhead, dv, T, C, Cv, R, G, Rv, Gv,
                   inv_sqrt_dk, eps, compute_dtype, approx_recip):
    f32 = jnp.float32
    NT = (((1,), (1,)), ((), ()))            # contract last dims: A @ B^T
    d_ff = w1T_ref.shape[1]

    def mxu_nn(a, b):                        # A @ B on the MXU, f32 accumulate
        return jnp.dot(a.astype(compute_dtype), b.astype(compute_dtype),
                       preferred_element_type=f32)

    def mxu_nt(a, b):                        # A @ B^T on the MXU, f32 accumulate
        return lax.dot_general(a.astype(compute_dtype), b.astype(compute_dtype),
                               NT, preferred_element_type=f32)

    def ln_cols(y, g, b):                    # LayerNorm over the feature axis (0)
        mu = jnp.mean(y, axis=0, keepdims=True)
        var = jnp.mean((y - mu) ** 2, axis=0, keepdims=True)
        return (y - mu) * lax.rsqrt(var + eps) * g + b

    xT = xT_ref[...].astype(f32)             # (d_model, T), carried through layers
    d_model = xT.shape[0]

    for l in range(num_layers):              # unrolled; all weights VMEM-resident
        wqkvT = wqkvT_ref[l]                 # (2C+Cv, d_model)
        woTp = woT_ref[l]                    # (d_model, nhead*dv), cols pre-permuted
        w1T = w1T_ref[l]                     # (d_ff, d_model)
        w2T = w2T_ref[l]                     # (d_model, d_ff)
        vd = vd_ref[l]                       # (d_model, 6) f32: bo|g1|be1|b2|g2|be2
        vw = vw_ref[l]                       # (max(2C+Cv,d_ff), 2) f32: bqkv|b1
        boT, g1, be1 = vd[:, 0:1], vd[:, 1:2], vd[:, 2:3]
        b2, g2, be2 = vd[:, 3:4], vd[:, 4:5], vd[:, 5:6]
        bqkvT = vw[0:2 * C + Cv, 0:1]        # (2C+Cv, 1)
        b1 = vw[0:d_ff, 1:2]                 # (d_ff, 1)

        # fused Q|K|V projection (transposed)
        qkvT = mxu_nn(wqkvT, xT) + bqkvT     # (2C+Cv, T) f32

        mhaT = jnp.zeros((d_model, T), dtype=f32)
        for h in range(nhead):               # unrolled over heads
            # one (T, dk) stack per head instead of G tiny K=R dots
            q_stk = jnp.concatenate(
                [qkvT[b * T:(b + 1) * T, h * R:(h + 1) * R] for b in range(G)],
                axis=1)                                           # (T, dk)
            k_stk = jnp.concatenate(
                [qkvT[C + b * T:C + (b + 1) * T, h * R:(h + 1) * R] for b in range(G)],
                axis=1)                                           # (T, dk)
            s = mxu_nt(q_stk, k_stk) * inv_sqrt_dk                # (T, T)

            # row-wise softmax (== transpose->Softmax(dim=1)->transpose in torch)
            m = jnp.max(s, axis=-1, keepdims=True)
            p = jnp.exp(s - m)
            denom = jnp.sum(p, axis=-1, keepdims=True)
            p = p * pl.reciprocal(denom, approx=approx_recip)

            v_stk = jnp.concatenate(
                [qkvT[2 * C + b * T:2 * C + (b + 1) * T, h * Rv:(h + 1) * Rv]
                 for b in range(Gv)], axis=1)                     # (T, dv) scrambled cols
            y = mxu_nn(p, v_stk)                                  # (T, dv)
            # out projection (wo columns pre-permuted to match y's column order)
            mhaT = mhaT + mxu_nt(woTp[:, h * dv:(h + 1) * dv], y)  # (d_model, T)
        mhaT = mhaT + boT

        # residual + LN1 (dropout1 = identity at eval)
        x1T = ln_cols(mhaT + xT, g1, be1)

        # Feedforward (transposed)
        h1T = jnp.maximum(mxu_nn(w1T, x1T) + b1, 0.0)             # (d_ff, T)
        xfT = mxu_nn(w2T, h1T) + b2                               # (d_model, T)

        # LN2(X + dropout2(X)) with X = FF output  ==  LN2(2*X) at eval
        xT = ln_cols(xfT + xfT, g2, be2)

    outT_ref[...] = xT.astype(outT_ref.dtype)                     # single HBM write


# ----------------------------------------------------------------------------
# Offline weight packing: QKV concat, transposes, head-permutation folded into
# wo, skinny vectors packed into two slabs.  Pure data layout, zero runtime cost.
# ----------------------------------------------------------------------------
def pack_params(layer_params, *, T, nhead, dk, dv, d_model, d_ff,
                weights_dtype=jnp.float32):
    C, Cv = dk * nhead, dv * nhead
    R = Rv = T // nhead
    G, Gv = C // T, Cv // T
    assert T % nhead == 0 and C % T == 0 and Cv % T == 0
    assert dk == R * G and dv == Rv * Gv

    # woTp column h*dv + b*Rv + a  <-  original wo row h*dv + Gv*a + b
    perm = np.array([h * dv + Gv * a + b
                     for h in range(nhead) for b in range(Gv) for a in range(Rv)],
                    dtype=np.int32)

    Nw = max(2 * C + Cv, d_ff)
    wqkvT, woT, w1T, w2T, vd, vw = [], [], [], [], [], []
    for p in layer_params:
        wqkvT.append(jnp.concatenate([p["wq"], p["wk"], p["wv"]], axis=1).T
                     .astype(weights_dtype))
        woT.append(p["wo"][perm, :].T.astype(weights_dtype))
        w1T.append(p["w1"].T.astype(weights_dtype))
        w2T.append(p["w2"].T.astype(weights_dtype))
        vd.append(jnp.stack([p["bo"], p["g1"], p["be1"],
                             p["b2"], p["g2"], p["be2"]], axis=1)
                  .astype(jnp.float32))                            # (d_model, 6)
        bqkv = jnp.concatenate([p["bq"], p["bk"], p["bv"]])        # (2C+Cv,)
        col0 = jnp.pad(bqkv, (0, Nw - bqkv.shape[0]))
        col1 = jnp.pad(p["b1"], (0, Nw - d_ff))
        vw.append(jnp.stack([col0, col1], axis=1).astype(jnp.float32))  # (Nw, 2)

    return dict(wqkvT=jnp.stack(wqkvT), woT=jnp.stack(woT),
                w1T=jnp.stack(w1T), w2T=jnp.stack(w2T),
                vd=jnp.stack(vd), vw=jnp.stack(vw))


def encoder_forward(X, packed, *, T, d_model, nhead, dk, dv, d_ff, num_layers,
                    compute_dtype=jnp.float32, approx_recip=False):
    C, Cv = dk * nhead, dv * nhead
    R = Rv = T // nhead
    G, Gv = C // T, Cv // T

    kern = functools.partial(
        encoder_kernel,
        num_layers=num_layers, nhead=nhead, dv=dv, T=T,
        C=C, Cv=Cv, R=R, G=G, Rv=Rv, Gv=Gv,
        inv_sqrt_dk=1.0 / math.sqrt(dk), eps=1e-5,
        compute_dtype=compute_dtype, approx_recip=approx_recip)

    # No grid, no BlockSpecs: every operand is a whole-array VMEM block fetched
    # once; the kernel runs exactly once and writes the single (d_model, T) result.
    outT = pl.pallas_call(
        kern,
        out_shape=jax.ShapeDtypeStruct((d_model, T), jnp.float32),
    )(X.T, packed["wqkvT"], packed["woT"], packed["w1T"], packed["w2T"],
      packed["vd"], packed["vw"])

    return outT.T   # back to (T, d_model); only XLA glue is X.T / outT.T


# ----------------------------------------------------------------------------
# Pure-JAX reference, bit-faithful to the PyTorch module (incl. the head
# reshape/transpose dance and the FF+FF second residual), for correctness.
# ----------------------------------------------------------------------------
def ref_forward(X, layer_params, *, T, d_model, nhead, dk, dv):
    def ln(y, g, b, eps=1e-5):
        mu = jnp.mean(y, axis=-1, keepdims=True)
        var = jnp.mean((y - mu) ** 2, axis=-1, keepdims=True)
        return (y - mu) / jnp.sqrt(var + eps) * g + b

    for p in layer_params:
        Qs = X @ p["wq"] + p["bq"]
        Ks = X @ p["wk"] + p["bk"]
        Vs = X @ p["wv"] + p["bv"]
        Qh = jnp.transpose(Qs.reshape(nhead, dk, T), (0, 2, 1))
        Kh = jnp.transpose(Ks.reshape(nhead, dk, T), (0, 2, 1))
        Vh = jnp.transpose(Vs.reshape(nhead, dv, T), (0, 2, 1))
        S = jnp.einsum("htd,hsd->hts", Qh, Kh) / math.sqrt(dk)
        P = jax.nn.softmax(S, axis=-1)
        A = jnp.einsum("hts,hsd->htd", P, Vh)
        A = jnp.transpose(A, (0, 2, 1)).reshape(-1, T).T
        mha = A @ p["wo"] + p["bo"]
        X1 = ln(mha + X, p["g1"], p["be1"])
        H = jnp.maximum(X1 @ p["w1"] + p["b1"], 0.0)
        Xf = H @ p["w2"] + p["b2"]
        X = ln(Xf + Xf, p["g2"], p["be2"])
    return X


# ----------------------------------------------------------------------------
# Deterministic parameter construction (original, un-packed layout)
# ----------------------------------------------------------------------------
def make_params(key, num_layers, d_model, d_ff, nhead, dk, dv):
    layers = []
    for _ in range(num_layers):
        keys = jax.random.split(key, 13)
        key = keys[-1]

        def w(k, shape, scale=0.05):
            return (scale * jax.random.normal(k, shape)).astype(jnp.float32)

        p = dict(
            wq=w(keys[0], (d_model, dk * nhead)), bq=w(keys[1], (dk * nhead,), 0.01),
            wk=w(keys[2], (d_model, dk * nhead)), bk=w(keys[3], (dk * nhead,), 0.01),
            wv=w(keys[4], (d_model, dv * nhead)), bv=w(keys[5], (dv * nhead,), 0.01),
            wo=w(keys[6], (dv * nhead, d_model)), bo=w(keys[7], (d_model,), 0.01),
            g1=jnp.ones((d_model,), jnp.float32), be1=jnp.zeros((d_model,), jnp.float32),
            w1=w(keys[8], (d_model, d_ff)),       b1=w(keys[9], (d_ff,), 0.01),
            w2=w(keys[10], (d_ff, d_model)),      b2=w(keys[11], (d_model,), 0.01),
            g2=jnp.ones((d_model,), jnp.float32), be2=jnp.zeros((d_model,), jnp.float32),
        )
        layers.append(p)
    return layers


# ----------------------------------------------------------------------------

if __name__ == "__main__":
    # small shapes consistent with the module
    T, d_model, nhead, d_ff, num_layers, dk, dv = 8, 32, 2, 64, 2, 16, 16

    key = jax.random.PRNGKey(0)
    kx, kp = jax.random.split(key)
    X = jax.random.normal(kx, (T, d_model), dtype=jnp.float32)
    params = make_params(kp, num_layers, d_model, d_ff, nhead, dk, dv)

    ref = ref_forward(X, params, T=T, d_model=d_model, nhead=nhead, dk=dk, dv=dv)

    # --- f32 path: tight parity with the PyTorch-faithful reference ---
    packed_f32 = pack_params(params, T=T, nhead=nhead, dk=dk, dv=dv,
                             d_model=d_model, d_ff=d_ff,
                             weights_dtype=jnp.float32)
    fwd_f32 = jax.jit(functools.partial(
        encoder_forward, T=T, d_model=d_model, nhead=nhead, dk=dk, dv=dv,
        d_ff=d_ff, num_layers=num_layers,
        compute_dtype=jnp.float32, approx_recip=False))
    out = jax.block_until_ready(fwd_f32(X, packed_f32))
    np.testing.assert_allclose(np.asarray(out), np.asarray(ref),
                               rtol=2e-4, atol=2e-4)

    # --- bf16-weights path (v6e/v7x: half the weight DMA bytes, native MXU
    #     bf16; LN/softmax kept f32).  Parity necessarily loosens to ~1e-3. ---
    packed_bf16 = pack_params(params, T=T, nhead=nhead, dk=dk, dv=dv,
                              d_model=d_model, d_ff=d_ff,
                              weights_dtype=jnp.bfloat16)
    fwd_bf16 = jax.jit(functools.partial(
        encoder_forward, T=T, d_model=d_model, nhead=nhead, dk=dk, dv=dv,
        d_ff=d_ff, num_layers=num_layers,
        compute_dtype=jnp.bfloat16, approx_recip=True))
    out_bf16 = jax.block_until_ready(fwd_bf16(X, packed_bf16))
    np.testing.assert_allclose(np.asarray(out_bf16), np.asarray(ref),
                               rtol=5e-2, atol=5e-2)

    print("KERNEL_OK")
</pallas_src>

<mosaic_0001>
module attributes {stable_mosaic.version = 11 : i64} {
  func.func @encoder_kernel(%arg0: memref<32x8xf32, #tpu.memory_space<vmem>>, %arg1: memref<2x96x32xf32, #tpu.memory_space<vmem>>, %arg2: memref<2x32x32xf32, #tpu.memory_space<vmem>>, %arg3: memref<2x64x32xf32, #tpu.memory_space<vmem>>, %arg4: memref<2x32x64xf32, #tpu.memory_space<vmem>>, %arg5: memref<2x32x6xf32, #tpu.memory_space<vmem>>, %arg6: memref<2x96x2xf32, #tpu.memory_space<vmem>>, %arg7: memref<32x8xf32, #tpu.memory_space<vmem>>) attributes {dimension_semantics = [], scalar_prefetch = 0 : i64, scratch_operands = 0 : i64, tpu.core_type = #tpu.core_type<tc>} {
    %c0 = arith.constant 0 : index
    %c0_0 = arith.constant 0 : index
    %0 = vector.load %arg0[%c0, %c0_0] : memref<32x8xf32, #tpu.memory_space<vmem>>, vector<32x8xf32>
    %c0_1 = arith.constant 0 : index
    %c0_2 = arith.constant 0 : index
    %c0_3 = arith.constant 0 : index
    %1 = vector.load %arg1[%c0_1, %c0_2, %c0_3] : memref<2x96x32xf32, #tpu.memory_space<vmem>>, vector<1x96x32xf32>
    %2 = vector.shape_cast %1 : vector<1x96x32xf32> to vector<96x32xf32>
    %c0_4 = arith.constant 0 : index
    %c0_5 = arith.constant 0 : index
    %c0_6 = arith.constant 0 : index
    %3 = vector.load %arg2[%c0_4, %c0_5, %c0_6] : memref<2x32x32xf32, #tpu.memory_space<vmem>>, vector<1x32x32xf32>
    %4 = vector.shape_cast %3 : vector<1x32x32xf32> to vector<32x32xf32>
    %c0_7 = arith.constant 0 : index
    %c0_8 = arith.constant 0 : index
    %c0_9 = arith.constant 0 : index
    %5 = vector.load %arg3[%c0_7, %c0_8, %c0_9] : memref<2x64x32xf32, #tpu.memory_space<vmem>>, vector<1x64x32xf32>
    %6 = vector.shape_cast %5 : vector<1x64x32xf32> to vector<64x32xf32>
    %c0_10 = arith.constant 0 : index
    %c0_11 = arith.constant 0 : index
    %c0_12 = arith.constant 0 : index
    %7 = vector.load %arg4[%c0_10, %c0_11, %c0_12] : memref<2x32x64xf32, #tpu.memory_space<vmem>>, vector<1x32x64xf32>
    %8 = vector.shape_cast %7 : vector<1x32x64xf32> to vector<32x64xf32>
    %c0_13 = arith.constant 0 : index
    %c0_14 = arith.constant 0 : index
    %c0_15 = arith.constant 0 : index
    %9 = vector.load %arg5[%c0_13, %c0_14, %c0_15] : memref<2x32x6xf32, #tpu.memory_space<vmem>>, vector<1x32x6xf32>
    %10 = vector.shape_cast %9 : vector<1x32x6xf32> to vector<32x6xf32>
    %c0_16 = arith.constant 0 : index
    %c0_17 = arith.constant 0 : index
    %c0_18 = arith.constant 0 : index
    %11 = vector.load %arg6[%c0_16, %c0_17, %c0_18] : memref<2x96x2xf32, #tpu.memory_space<vmem>>, vector<1x96x2xf32>
    %12 = vector.shape_cast %11 : vector<1x96x2xf32> to vector<96x2xf32>
    %13 = vector.extract_strided_slice %10 {offsets = [0, 0], sizes = [32, 1], strides = [1, 1]} : vector<32x6xf32> to vector<32x1xf32>
    %14 = vector.extract_strided_slice %10 {offsets = [0, 1], sizes = [32, 1], strides = [1, 1]} : vector<32x6xf32> to vector<32x1xf32>
    %15 = vector.extract_strided_slice %10 {offsets = [0, 2], sizes = [32, 1], strides = [1, 1]} : vector<32x6xf32> to vector<32x1xf32>
    %16 = vector.extract_strided_slice %10 {offsets = [0, 3], sizes = [32, 1], strides = [1, 1]} : vector<32x6xf32> to vector<32x1xf32>
    %17 = vector.extract_strided_slice %10 {offsets = [0, 4], sizes = [32, 1], strides = [1, 1]} : vector<32x6xf32> to vector<32x1xf32>
    %18 = vector.extract_strided_slice %10 {offsets = [0, 5], sizes = [32, 1], strides = [1, 1]} : vector<32x6xf32> to vector<32x1xf32>
    %19 = vector.extract_strided_slice %12 {offsets = [0, 0], sizes = [96, 1], strides = [1, 1]} : vector<96x2xf32> to vector<96x1xf32>
    %20 = vector.extract_strided_slice %12 {offsets = [0, 1], sizes = [64, 1], strides = [1, 1]} : vector<96x2xf32> to vector<64x1xf32>
    %cst = arith.constant dense<0.000000e+00> : vector<96x8xf32>
    %21 = tpu.matmul %2, %0, %cst {dimension_numbers = #tpu.dot_dimension_numbers<[1], [0], [0], [1], [0, 0, 1, 1], [], []>} : vector<96x32xf32>, vector<32x8xf32>, vector<96x8xf32> -> vector<96x8xf32>
    %22 = vector.broadcast %19 : vector<96x1xf32> to vector<96x8xf32>
    %23 = arith.addf %21, %22 : vector<96x8xf32>
    %cst_19 = arith.constant 0.000000e+00 : f32
    %24 = vector.broadcast %cst_19 : f32 to vector<32x8xf32>
    %25 = vector.extract_strided_slice %23 {offsets = [0, 0], sizes = [8, 4], strides = [1, 1]} : vector<96x8xf32> to vector<8x4xf32>
    %26 = vector.extract_strided_slice %23 {offsets = [8, 0], sizes = [8, 4], strides = [1, 1]} : vector<96x8xf32> to vector<8x4xf32>
    %27 = vector.extract_strided_slice %23 {offsets = [16, 0], sizes = [8, 4], strides = [1, 1]} : vector<96x8xf32> to vector<8x4xf32>
    %28 = vector.extract_strided_slice %23 {offsets = [24, 0], sizes = [8, 4], strides = [1, 1]} : vector<96x8xf32> to vector<8x4xf32>
    %29 = tpu.concatenate %25, %26, %27, %28 in 1 : vector<8x4xf32>, vector<8x4xf32>, vector<8x4xf32>, vector<8x4xf32> -> vector<8x16xf32>
    %30 = vector.extract_strided_slice %23 {offsets = [32, 0], sizes = [8, 4], strides = [1, 1]} : vector<96x8xf32> to vector<8x4xf32>
    %31 = vector.extract_strided_slice %23 {offsets = [40, 0], sizes = [8, 4], strides = [1, 1]} : vector<96x8xf32> to vector<8x4xf32>
    %32 = vector.extract_strided_slice %23 {offsets = [48, 0], sizes = [8, 4], strides = [1, 1]} : vector<96x8xf32> to vector<8x4xf32>
    %33 = vector.extract_strided_slice %23 {offsets = [56, 0], sizes = [8, 4], strides = [1, 1]} : vector<96x8xf32> to vector<8x4xf32>
    %34 = tpu.concatenate %30, %31, %32, %33 in 1 : vector<8x4xf32>, vector<8x4xf32>, vector<8x4xf32>, vector<8x4xf32> -> vector<8x16xf32>
    %cst_20 = arith.constant dense<0.000000e+00> : vector<8x8xf32>
    %35 = tpu.matmul %29, %34, %cst_20 {dimension_numbers = #tpu.dot_dimension_numbers<[1], [1], [0], [0], [0, 0, 1, 0], [], []>} : vector<8x16xf32>, vector<8x16xf32>, vector<8x8xf32> -> vector<8x8xf32>
    %cst_21 = arith.constant 2.500000e-01 : f32
    %36 = vector.broadcast %cst_21 : f32 to vector<8x8xf32>
    %37 = arith.mulf %35, %36 : vector<8x8xf32>
    %cst_22 = arith.constant dense<0xFF800000> : vector<8xf32>
    %38 = vector.multi_reduction <maximumf>, %37, %cst_22 [1] : vector<8x8xf32> to vector<8xf32>
    %39 = vector.shape_cast %38 : vector<8xf32> to vector<8x1xf32>
    %40 = vector.broadcast %39 : vector<8x1xf32> to vector<8x8xf32>
    %41 = arith.subf %37, %40 : vector<8x8xf32>
    %42 = math.exp %41 : vector<8x8xf32>
    %cst_23 = arith.constant dense<0.000000e+00> : vector<8xf32>
    %43 = vector.multi_reduction <add>, %42, %cst_23 [1] : vector<8x8xf32> to vector<8xf32>
    %44 = vector.shape_cast %43 : vector<8xf32> to vector<8x1xf32>
    %45 = tpu.reciprocal %44 : vector<8x1xf32> -> vector<8x1xf32>
    %46 = vector.broadcast %45 : vector<8x1xf32> to vector<8x8xf32>
    %47 = arith.mulf %42, %46 : vector<8x8xf32>
    %48 = vector.extract_strided_slice %23 {offsets = [64, 0], sizes = [8, 4], strides = [1, 1]} : vector<96x8xf32> to vector<8x4xf32>
    %49 = vector.extract_strided_slice %23 {offsets = [72, 0], sizes = [8, 4], strides = [1, 1]} : vector<96x8xf32> to vector<8x4xf32>
    %50 = vector.extract_strided_slice %23 {offsets = [80, 0], sizes = [8, 4], strides = [1, 1]} : vector<96x8xf32> to vector<8x4xf32>
    %51 = vector.extract_strided_slice %23 {offsets = [88, 0], sizes = [8, 4], strides = [1, 1]} : vector<96x8xf32> to vector<8x4xf32>
    %52 = tpu.concatenate %48, %49, %50, %51 in 1 : vector<8x4xf32>, vector<8x4xf32>, vector<8x4xf32>, vector<8x4xf32> -> vector<8x16xf32>
    %cst_24 = arith.constant dense<0.000000e+00> : vector<8x16xf32>
    %53 = tpu.matmul %47, %52, %cst_24 {dimension_numbers = #tpu.dot_dimension_numbers<[1], [0], [0], [1], [0, 0, 1, 1], [], []>} : vector<8x8xf32>, vector<8x16xf32>, vector<8x16xf32> -> vector<8x16xf32>
    %54 = vector.extract_strided_slice %4 {offsets = [0, 0], sizes = [32, 16], strides = [1, 1]} : vector<32x32xf32> to vector<32x16xf32>
    %cst_25 = arith.constant dense<0.000000e+00> : vector<32x8xf32>
    %55 = tpu.matmul %54, %53, %cst_25 {dimension_numbers = #tpu.dot_dimension_numbers<[1], [1], [0], [0], [0, 0, 1, 0], [], []>} : vector<32x16xf32>, vector<8x16xf32>, vector<32x8xf32> -> vector<32x8xf32>
    %56 = arith.addf %24, %55 : vector<32x8xf32>
    %57 = vector.extract_strided_slice %23 {offsets = [0, 4], sizes = [8, 4], strides = [1, 1]} : vector<96x8xf32> to vector<8x4xf32>
    %58 = vector.extract_strided_slice %23 {offsets = [8, 4], sizes = [8, 4], strides = [1, 1]} : vector<96x8xf32> to vector<8x4xf32>
    %59 = vector.extract_strided_slice %23 {offsets = [16, 4], sizes = [8, 4], strides = [1, 1]} : vector<96x8xf32> to vector<8x4xf32>
    %60 = vector.extract_strided_slice %23 {offsets = [24, 4], sizes = [8, 4], strides = [1, 1]} : vector<96x8xf32> to vector<8x4xf32>
    %61 = tpu.concatenate %57, %58, %59, %60 in 1 : vector<8x4xf32>, vector<8x4xf32>, vector<8x4xf32>, vector<8x4xf32> -> vector<8x16xf32>
    %62 = vector.extract_strided_slice %23 {offsets = [32, 4], sizes = [8, 4], strides = [1, 1]} : vector<96x8xf32> to vector<8x4xf32>
    %63 = vector.extract_strided_slice %23 {offsets = [40, 4], sizes = [8, 4], strides = [1, 1]} : vector<96x8xf32> to vector<8x4xf32>
    %64 = vector.extract_strided_slice %23 {offsets = [48, 4], sizes = [8, 4], strides = [1, 1]} : vector<96x8xf32> to vector<8x4xf32>
    %65 = vector.extract_strided_slice %23 {offsets = [56, 4], sizes = [8, 4], strides = [1, 1]} : vector<96x8xf32> to vector<8x4xf32>
    %66 = tpu.concatenate %62, %63, %64, %65 in 1 : vector<8x4xf32>, vector<8x4xf32>, vector<8x4xf32>, vector<8x4xf32> -> vector<8x16xf32>
    %cst_26 = arith.constant dense<0.000000e+00> : vector<8x8xf32>
    %67 = tpu.matmul %61, %66, %cst_26 {dimension_numbers = #tpu.dot_dimension_numbers<[1], [1], [0], [0], [0, 0, 1, 0], [], []>} : vector<8x16xf32>, vector<8x16xf32>, vector<8x8xf32> -> vector<8x8xf32>
    %cst_27 = arith.constant 2.500000e-01 : f32
    %68 = vector.broadcast %cst_27 : f32 to vector<8x8xf32>
    %69 = arith.mulf %67, %68 : vector<8x8xf32>
    %cst_28 = arith.constant dense<0xFF800000> : vector<8xf32>
    %70 = vector.multi_reduction <maximumf>, %69, %cst_28 [1] : vector<8x8xf32> to vector<8xf32>
    %71 = vector.shape_cast %70 : vector<8xf32> to vector<8x1xf32>
    %72 = vector.broadcast %71 : vector<8x1xf32> to vector<8x8xf32>
    %73 = arith.subf %69, %72 : vector<8x8xf32>
    %74 = math.exp %73 : vector<8x8xf32>
    %cst_29 = arith.constant dense<0.000000e+00> : vector<8xf32>
    %75 = vector.multi_reduction <add>, %74, %cst_29 [1] : vector<8x8xf32> to vector<8xf32>
    %76 = vector.shape_cast %75 : vector<8xf32> to vector<8x1xf32>
    %77 = tpu.reciprocal %76 : vector<8x1xf32> -> vector<8x1xf32>
    %78 = vector.broadcast %77 : vector<8x1xf32> to vector<8x8xf32>
    %79 = arith.mulf %74, %78 : vector<8x8xf32>
    %80 = vector.extract_strided_slice %23 {offsets = [64, 4], sizes = [8, 4], strides = [1, 1]} : vector<96x8xf32> to vector<8x4xf32>
    %81 = vector.extract_strided_slice %23 {offsets = [72, 4], sizes = [8, 4], strides = [1, 1]} : vector<96x8xf32> to vector<8x4xf32>
    %82 = vector.extract_strided_slice %23 {offsets = [80, 4], sizes = [8, 4], strides = [1, 1]} : vector<96x8xf32> to vector<8x4xf32>
    %83 = vector.extract_strided_slice %23 {offsets = [88, 4], sizes = [8, 4], strides = [1, 1]} : vector<96x8xf32> to vector<8x4xf32>
    %84 = tpu.concatenate %80, %81, %82, %83 in 1 : vector<8x4xf32>, vector<8x4xf32>, vector<8x4xf32>, vector<8x4xf32> -> vector<8x16xf32>
    %cst_30 = arith.constant dense<0.000000e+00> : vector<8x16xf32>
    %85 = tpu.matmul %79, %84, %cst_30 {dimension_numbers = #tpu.dot_dimension_numbers<[1], [0], [0], [1], [0, 0, 1, 1], [], []>} : vector<8x8xf32>, vector<8x16xf32>, vector<8x16xf32> -> vector<8x16xf32>
    %86 = vector.extract_strided_slice %4 {offsets = [0, 16], sizes = [32, 16], strides = [1, 1]} : vector<32x32xf32> to vector<32x16xf32>
    %cst_31 = arith.constant dense<0.000000e+00> : vector<32x8xf32>
    %87 = tpu.matmul %86, %85, %cst_31 {dimension_numbers = #tpu.dot_dimension_numbers<[1], [1], [0], [0], [0, 0, 1, 0], [], []>} : vector<32x16xf32>, vector<8x16xf32>, vector<32x8xf32> -> vector<32x8xf32>
    %88 = arith.addf %56, %87 : vector<32x8xf32>
    %89 = vector.broadcast %13 : vector<32x1xf32> to vector<32x8xf32>
    %90 = arith.addf %88, %89 : vector<32x8xf32>
    %91 = arith.addf %90, %0 : vector<32x8xf32>
    %cst_32 = arith.constant dense<0.000000e+00> : vector<8xf32>
    %92 = vector.multi_reduction <add>, %91, %cst_32 [0] : vector<32x8xf32> to vector<8xf32>
    %93 = vector.shape_cast %92 : vector<8xf32> to vector<1x8xf32>
    %cst_33 = arith.constant 3.200000e+01 : f32
    %94 = vector.broadcast %cst_33 : f32 to vector<1x8xf32>
    %95 = arith.divf %93, %94 : vector<1x8xf32>
    %96 = vector.broadcast %95 : vector<1x8xf32> to vector<32x8xf32>
    %97 = arith.subf %91, %96 : vector<32x8xf32>
    %98 = arith.mulf %97, %97 : vector<32x8xf32>
    %cst_34 = arith.constant dense<0.000000e+00> : vector<8xf32>
    %99 = vector.multi_reduction <add>, %98, %cst_34 [0] : vector<32x8xf32> to vector<8xf32>
    %100 = vector.shape_cast %99 : vector<8xf32> to vector<1x8xf32>
    %cst_35 = arith.constant 3.200000e+01 : f32
    %101 = vector.broadcast %cst_35 : f32 to vector<1x8xf32>
    %102 = arith.divf %100, %101 : vector<1x8xf32>
    %103 = vector.broadcast %95 : vector<1x8xf32> to vector<32x8xf32>
    %104 = arith.subf %91, %103 : vector<32x8xf32>
    %cst_36 = arith.constant 9.99999974E-6 : f32
    %105 = vector.broadcast %cst_36 : f32 to vector<1x8xf32>
    %106 = arith.addf %102, %105 : vector<1x8xf32>
    %107 = math.rsqrt %106 : vector<1x8xf32>
    %108 = vector.broadcast %107 : vector<1x8xf32> to vector<32x8xf32>
    %109 = arith.mulf %104, %108 : vector<32x8xf32>
    %110 = vector.broadcast %14 : vector<32x1xf32> to vector<32x8xf32>
    %111 = arith.mulf %109, %110 : vector<32x8xf32>
    %112 = vector.broadcast %15 : vector<32x1xf32> to vector<32x8xf32>
    %113 = arith.addf %111, %112 : vector<32x8xf32>
    %cst_37 = arith.constant dense<0.000000e+00> : vector<64x8xf32>
    %114 = tpu.matmul %6, %113, %cst_37 {dimension_numbers = #tpu.dot_dimension_numbers<[1], [0], [0], [1], [0, 0, 1, 1], [], []>} : vector<64x32xf32>, vector<32x8xf32>, vector<64x8xf32> -> vector<64x8xf32>
    %115 = vector.broadcast %20 : vector<64x1xf32> to vector<64x8xf32>
    %116 = arith.addf %114, %115 : vector<64x8xf32>
    %cst_38 = arith.constant 0.000000e+00 : f32
    %117 = vector.broadcast %cst_38 : f32 to vector<64x8xf32>
    %118 = arith.maximumf %116, %117 : vector<64x8xf32>
    %cst_39 = arith.constant dense<0.000000e+00> : vector<32x8xf32>
    %119 = tpu.matmul %8, %118, %cst_39 {dimension_numbers = #tpu.dot_dimension_numbers<[1], [0], [0], [1], [0, 0, 1, 1], [], []>} : vector<32x64xf32>, vector<64x8xf32>, vector<32x8xf32> -> vector<32x8xf32>
    %120 = vector.broadcast %16 : vector<32x1xf32> to vector<32x8xf32>
    %121 = arith.addf %119, %120 : vector<32x8xf32>
    %122 = arith.addf %121, %121 : vector<32x8xf32>
    %cst_40 = arith.constant dense<0.000000e+00> : vector<8xf32>
    %123 = vector.multi_reduction <add>, %122, %cst_40 [0] : vector<32x8xf32> to vector<8xf32>
    %124 = vector.shape_cast %123 : vector<8xf32> to vector<1x8xf32>
    %cst_41 = arith.constant 3.200000e+01 : f32
    %125 = vector.broadcast %cst_41 : f32 to vector<1x8xf32>
    %126 = arith.divf %124, %125 : vector<1x8xf32>
    %127 = vector.broadcast %126 : vector<1x8xf32> to vector<32x8xf32>
    %128 = arith.subf %122, %127 : vector<32x8xf32>
    %129 = arith.mulf %128, %128 : vector<32x8xf32>
    %cst_42 = arith.constant dense<0.000000e+00> : vector<8xf32>
    %130 = vector.multi_reduction <add>, %129, %cst_42 [0] : vector<32x8xf32> to vector<8xf32>
    %131 = vector.shape_cast %130 : vector<8xf32> to vector<1x8xf32>
    %cst_43 = arith.constant 3.200000e+01 : f32
    %132 = vector.broadcast %cst_43 : f32 to vector<1x8xf32>
    %133 = arith.divf %131, %132 : vector<1x8xf32>
    %134 = vector.broadcast %126 : vector<1x8xf32> to vector<32x8xf32>
    %135 = arith.subf %122, %134 : vector<32x8xf32>
    %cst_44 = arith.constant 9.99999974E-6 : f32
    %136 = vector.broadcast %cst_44 : f32 to vector<1x8xf32>
    %137 = arith.addf %133, %136 : vector<1x8xf32>
    %138 = math.rsqrt %137 : vector<1x8xf32>
    %139 = vector.broadcast %138 : vector<1x8xf32> to vector<32x8xf32>
    %140 = arith.mulf %135, %139 : vector<32x8xf32>
    %141 = vector.broadcast %17 : vector<32x1xf32> to vector<32x8xf32>
    %142 = arith.mulf %140, %141 : vector<32x8xf32>
    %143 = vector.broadcast %18 : vector<32x1xf32> to vector<32x8xf32>
    %144 = arith.addf %142, %143 : vector<32x8xf32>
    %c1 = arith.constant 1 : index
    %c0_45 = arith.constant 0 : index
    %c0_46 = arith.constant 0 : index
    %145 = vector.load %arg1[%c1, %c0_45, %c0_46] : memref<2x96x32xf32, #tpu.memory_space<vmem>>, vector<1x96x32xf32>
    %146 = vector.shape_cast %145 : vector<1x96x32xf32> to vector<96x32xf32>
    %c1_47 = arith.constant 1 : index
    %c0_48 = arith.constant 0 : index
    %c0_49 = arith.constant 0 : index
    %147 = vector.load %arg2[%c1_47, %c0_48, %c0_49] : memref<2x32x32xf32, #tpu.memory_space<vmem>>, vector<1x32x32xf32>
    %148 = vector.shape_cast %147 : vector<1x32x32xf32> to vector<32x32xf32>
    %c1_50 = arith.constant 1 : index
    %c0_51 = arith.constant 0 : index
    %c0_52 = arith.constant 0 : index
    %149 = vector.load %arg3[%c1_50, %c0_51, %c0_52] : memref<2x64x32xf32, #tpu.memory_space<vmem>>, vector<1x64x32xf32>
    %150 = vector.shape_cast %149 : vector<1x64x32xf32> to vector<64x32xf32>
    %c1_53 = arith.constant 1 : index
    %c0_54 = arith.constant 0 : index
    %c0_55 = arith.constant 0 : index
    %151 = vector.load %arg4[%c1_53, %c0_54, %c0_55] : memref<2x32x64xf32, #tpu.memory_space<vmem>>, vector<1x32x64xf32>
    %152 = vector.shape_cast %151 : vector<1x32x64xf32> to vector<32x64xf32>
    %c1_56 = arith.constant 1 : index
    %c0_57 = arith.constant 0 : index
    %c0_58 = arith.constant 0 : index
    %153 = vector.load %arg5[%c1_56, %c0_57, %c0_58] : memref<2x32x6xf32, #tpu.memory_space<vmem>>, vector<1x32x6xf32>
    %154 = vector.shape_cast %153 : vector<1x32x6xf32> to vector<32x6xf32>
    %c1_59 = arith.constant 1 : index
    %c0_60 = arith.constant 0 : index
    %c0_61 = arith.constant 0 : index
    %155 = vector.load %arg6[%c1_59, %c0_60, %c0_61] : memref<2x96x2xf32, #tpu.memory_space<vmem>>, vector<1x96x2xf32>
    %156 = vector.shape_cast %155 : vector<1x96x2xf32> to vector<96x2xf32>
    %157 = vector.extract_strided_slice %154 {offsets = [0, 0], sizes = [32, 1], strides = [1, 1]} : vector<32x6xf32> to vector<32x1xf32>
    %158 = vector.extract_strided_slice %154 {offsets = [0, 1], sizes = [32, 1], strides = [1, 1]} : vector<32x6xf32> to vector<32x1xf32>
    %159 = vector.extract_strided_slice %154 {offsets = [0, 2], sizes = [32, 1], strides = [1, 1]} : vector<32x6xf32> to vector<32x1xf32>
    %160 = vector.extract_strided_slice %154 {offsets = [0, 3], sizes = [32, 1], strides = [1, 1]} : vector<32x6xf32> to vector<32x1xf32>
    %161 = vector.extract_strided_slice %154 {offsets = [0, 4], sizes = [32, 1], strides = [1, 1]} : vector<32x6xf32> to vector<32x1xf32>
    %162 = vector.extract_strided_slice %154 {offsets = [0, 5], sizes = [32, 1], strides = [1, 1]} : vector<32x6xf32> to vector<32x1xf32>
    %163 = vector.extract_strided_slice %156 {offsets = [0, 0], sizes = [96, 1], strides = [1, 1]} : vector<96x2xf32> to vector<96x1xf32>
    %164 = vector.extract_strided_slice %156 {offsets = [0, 1], sizes = [64, 1], strides = [1, 1]} : vector<96x2xf32> to vector<64x1xf32>
    %cst_62 = arith.constant dense<0.000000e+00> : vector<96x8xf32>
    %165 = tpu.matmul %146, %144, %cst_62 {dimension_numbers = #tpu.dot_dimension_numbers<[1], [0], [0], [1], [0, 0, 1, 1], [], []>} : vector<96x32xf32>, vector<32x8xf32>, vector<96x8xf32> -> vector<96x8xf32>
    %166 = vector.broadcast %163 : vector<96x1xf32> to vector<96x8xf32>
    %167 = arith.addf %165, %166 : vector<96x8xf32>
    %cst_63 = arith.constant 0.000000e+00 : f32
    %168 = vector.broadcast %cst_63 : f32 to vector<32x8xf32>
    %169 = vector.extract_strided_slice %167 {offsets = [0, 0], sizes = [8, 4], strides = [1, 1]} : vector<96x8xf32> to vector<8x4xf32>
    %170 = vector.extract_strided_slice %167 {offsets = [8, 0], sizes = [8, 4], strides = [1, 1]} : vector<96x8xf32> to vector<8x4xf32>
    %171 = vector.extract_strided_slice %167 {offsets = [16, 0], sizes = [8, 4], strides = [1, 1]} : vector<96x8xf32> to vector<8x4xf32>
    %172 = vector.extract_strided_slice %167 {offsets = [24, 0], sizes = [8, 4], strides = [1, 1]} : vector<96x8xf32> to vector<8x4xf32>
    %173 = tpu.concatenate %169, %170, %171, %172 in 1 : vector<8x4xf32>, vector<8x4xf32>, vector<8x4xf32>, vector<8x4xf32> -> vector<8x16xf32>
    %174 = vector.extract_strided_slice %167 {offsets = [32, 0], sizes = [8, 4], strides = [1, 1]} : vector<96x8xf32> to vector<8x4xf32>
    %175 = vector.extract_strided_slice %167 {offsets = [40, 0], sizes = [8, 4], strides = [1, 1]} : vector<96x8xf32> to vector<8x4xf32>
    %176 = vector.extract_strided_slice %167 {offsets = [48, 0], sizes = [8, 4], strides = [1, 1]} : vector<96x8xf32> to vector<8x4xf32>
    %177 = vector.extract_strided_slice %167 {offsets = [56, 0], sizes = [8, 4], strides = [1, 1]} : vector<96x8xf32> to vector<8x4xf32>
    %178 = tpu.concatenate %174, %175, %176, %177 in 1 : vector<8x4xf32>, vector<8x4xf32>, vector<8x4xf32>, vector<8x4xf32> -> vector<8x16xf32>
    %cst_64 = arith.constant dense<0.000000e+00> : vector<8x8xf32>
    %179 = tpu.matmul %173, %178, %cst_64 {dimension_numbers = #tpu.dot_dimension_numbers<[1], [1], [0], [0], [0, 0, 1, 0], [], []>} : vector<8x16xf32>, vector<8x16xf32>, vector<8x8xf32> -> vector<8x8xf32>
    %cst_65 = arith.constant 2.500000e-01 : f32
    %180 = vector.broadcast %cst_65 : f32 to vector<8x8xf32>
    %181 = arith.mulf %179, %180 : vector<8x8xf32>
    %cst_66 = arith.constant dense<0xFF800000> : vector<8xf32>
    %182 = vector.multi_reduction <maximumf>, %181, %cst_66 [1] : vector<8x8xf32> to vector<8xf32>
    %183 = vector.shape_cast %182 : vector<8xf32> to vector<8x1xf32>
    %184 = vector.broadcast %183 : vector<8x1xf32> to vector<8x8xf32>
    %185 = arith.subf %181, %184 : vector<8x8xf32>
    %186 = math.exp %185 : vector<8x8xf32>
    %cst_67 = arith.constant dense<0.000000e+00> : vector<8xf32>
    %187 = vector.multi_reduction <add>, %186, %cst_67 [1] : vector<8x8xf32> to vector<8xf32>
    %188 = vector.shape_cast %187 : vector<8xf32> to vector<8x1xf32>
    %189 = tpu.reciprocal %188 : vector<8x1xf32> -> vector<8x1xf32>
    %190 = vector.broadcast %189 : vector<8x1xf32> to vector<8x8xf32>
    %191 = arith.mulf %186, %190 : vector<8x8xf32>
    %192 = vector.extract_strided_slice %167 {offsets = [64, 0], sizes = [8, 4], strides = [1, 1]} : vector<96x8xf32> to vector<8x4xf32>
    %193 = vector.extract_strided_slice %167 {offsets = [72, 0], sizes = [8, 4], strides = [1, 1]} : vector<96x8xf32> to vector<8x4xf32>
    %194 = vector.extract_strided_slice %167 {offsets = [80, 0], sizes = [8, 4], strides = [1, 1]} : vector<96x8xf32> to vector<8x4xf32>
    %195 = vector.extract_strided_slice %167 {offsets = [88, 0], sizes = [8, 4], strides = [1, 1]} : vector<96x8xf32> to vector<8x4xf32>
    %196 = tpu.concatenate %192, %193, %194, %195 in 1 : vector<8x4xf32>, vector<8x4xf32>, vector<8x4xf32>, vector<8x4xf32> -> vector<8x16xf32>
    %cst_68 = arith.constant dense<0.000000e+00> : vector<8x16xf32>
    %197 = tpu.matmul %191, %196, %cst_68 {dimension_numbers = #tpu.dot_dimension_numbers<[1], [0], [0], [1], [0, 0, 1, 1], [], []>} : vector<8x8xf32>, vector<8x16xf32>, vector<8x16xf32> -> vector<8x16xf32>
    %198 = vector.extract_strided_slice %148 {offsets = [0, 0], sizes = [32, 16], strides = [1, 1]} : vector<32x32xf32> to vector<32x16xf32>
    %cst_69 = arith.constant dense<0.000000e+00> : vector<32x8xf32>
    %199 = tpu.matmul %198, %197, %cst_69 {dimension_numbers = #tpu.dot_dimension_numbers<[1], [1], [0], [0], [0, 0, 1, 0], [], []>} : vector<32x16xf32>, vector<8x16xf32>, vector<32x8xf32> -> vector<32x8xf32>
    %200 = arith.addf %168, %199 : vector<32x8xf32>
    %201 = vector.extract_strided_slice %167 {offsets = [0, 4], sizes = [8, 4], strides = [1, 1]} : vector<96x8xf32> to vector<8x4xf32>
    %202 = vector.extract_strided_slice %167 {offsets = [8, 4], sizes = [8, 4], strides = [1, 1]} : vector<96x8xf32> to vector<8x4xf32>
    %203 = vector.extract_strided_slice %167 {offsets = [16, 4], sizes = [8, 4], strides = [1, 1]} : vector<96x8xf32> to vector<8x4xf32>
    %204 = vector.extract_strided_slice %167 {offsets = [24, 4], sizes = [8, 4], strides = [1, 1]} : vector<96x8xf32> to vector<8x4xf32>
    %205 = tpu.concatenate %201, %202, %203, %204 in 1 : vector<8x4xf32>, vector<8x4xf32>, vector<8x4xf32>, vector<8x4xf32> -> vector<8x16xf32>
    %206 = vector.extract_strided_slice %167 {offsets = [32, 4], sizes = [8, 4], strides = [1, 1]} : vector<96x8xf32> to vector<8x4xf32>
    %207 = vector.extract_strided_slice %167 {offsets = [40, 4], sizes = [8, 4], strides = [1, 1]} : vector<96x8xf32> to vector<8x4xf32>
    %208 = vector.extract_strided_slice %167 {offsets = [48, 4], sizes = [8, 4], strides = [1, 1]} : vector<96x8xf32> to vector<8x4xf32>
    %209 = vector.extract_strided_slice %167 {offsets = [56, 4], sizes = [8, 4], strides = [1, 1]} : vector<96x8xf32> to vector<8x4xf32>
    %210 = tpu.concatenate %206, %207, %208, %209 in 1 : vector<8x4xf32>, vector<8x4xf32>, vector<8x4xf32>, vector<8x4xf32> -> vector<8x16xf32>
    %cst_70 = arith.constant dense<0.000000e+00> : vector<8x8xf32>
    %211 = tpu.matmul %205, %210, %cst_70 {dimension_numbers = #tpu.dot_dimension_numbers<[1], [1], [0], [0], [0, 0, 1, 0], [], []>} : vector<8x16xf32>, vector<8x16xf32>, vector<8x8xf32> -> vector<8x8xf32>
    %cst_71 = arith.constant 2.500000e-01 : f32
    %212 = vector.broadcast %cst_71 : f32 to vector<8x8xf32>
    %213 = arith.mulf %211, %212 : vector<8x8xf32>
    %cst_72 = arith.constant dense<0xFF800000> : vector<8xf32>
    %214 = vector.multi_reduction <maximumf>, %213, %cst_72 [1] : vector<8x8xf32> to vector<8xf32>
    %215 = vector.shape_cast %214 : vector<8xf32> to vector<8x1xf32>
    %216 = vector.broadcast %215 : vector<8x1xf32> to vector<8x8xf32>
    %217 = arith.subf %213, %216 : vector<8x8xf32>
    %218 = math.exp %217 : vector<8x8xf32>
    %cst_73 = arith.constant dense<0.000000e+00> : vector<8xf32>
    %219 = vector.multi_reduction <add>, %218, %cst_73 [1] : vector<8x8xf32> to vector<8xf32>
    %220 = vector.shape_cast %219 : vector<8xf32> to vector<8x1xf32>
    %221 = tpu.reciprocal %220 : vector<8x1xf32> -> vector<8x1xf32>
    %222 = vector.broadcast %221 : vector<8x1xf32> to vector<8x8xf32>
    %223 = arith.mulf %218, %222 : vector<8x8xf32>
    %224 = vector.extract_strided_slice %167 {offsets = [64, 4], sizes = [8, 4], strides = [1, 1]} : vector<96x8xf32> to vector<8x4xf32>
    %225 = vector.extract_strided_slice %167 {offsets = [72, 4], sizes = [8, 4], strides = [1, 1]} : vector<96x8xf32> to vector<8x4xf32>
    %226 = vector.extract_strided_slice %167 {offsets = [80, 4], sizes = [8, 4], strides = [1, 1]} : vector<96x8xf32> to vector<8x4xf32>
    %227 = vector.extract_strided_slice %167 {offsets = [88, 4], sizes = [8, 4], strides = [1, 1]} : vector<96x8xf32> to vector<8x4xf32>
    %228 = tpu.concatenate %224, %225, %226, %227 in 1 : vector<8x4xf32>, vector<8x4xf32>, vector<8x4xf32>, vector<8x4xf32> -> vector<8x16xf32>
    %cst_74 = arith.constant dense<0.000000e+00> : vector<8x16xf32>
    %229 = tpu.matmul %223, %228, %cst_74 {dimension_numbers = #tpu.dot_dimension_numbers<[1], [0], [0], [1], [0, 0, 1, 1], [], []>} : vector<8x8xf32>, vector<8x16xf32>, vector<8x16xf32> -> vector<8x16xf32>
    %230 = vector.extract_strided_slice %148 {offsets = [0, 16], sizes = [32, 16], strides = [1, 1]} : vector<32x32xf32> to vector<32x16xf32>
    %cst_75 = arith.constant dense<0.000000e+00> : vector<32x8xf32>
    %231 = tpu.matmul %230, %229, %cst_75 {dimension_numbers = #tpu.dot_dimension_numbers<[1], [1], [0], [0], [0, 0, 1, 0], [], []>} : vector<32x16xf32>, vector<8x16xf32>, vector<32x8xf32> -> vector<32x8xf32>
    %232 = arith.addf %200, %231 : vector<32x8xf32>
    %233 = vector.broadcast %157 : vector<32x1xf32> to vector<32x8xf32>
    %234 = arith.addf %232, %233 : vector<32x8xf32>
    %235 = arith.addf %234, %144 : vector<32x8xf32>
    %cst_76 = arith.constant dense<0.000000e+00> : vector<8xf32>
    %236 = vector.multi_reduction <add>, %235, %cst_76 [0] : vector<32x8xf32> to vector<8xf32>
    %237 = vector.shape_cast %236 : vector<8xf32> to vector<1x8xf32>
    %cst_77 = arith.constant 3.200000e+01 : f32
    %238 = vector.broadcast %cst_77 : f32 to vector<1x8xf32>
    %239 = arith.divf %237, %238 : vector<1x8xf32>
    %240 = vector.broadcast %239 : vector<1x8xf32> to vector<32x8xf32>
    %241 = arith.subf %235, %240 : vector<32x8xf32>
    %242 = arith.mulf %241, %241 : vector<32x8xf32>
    %cst_78 = arith.constant dense<0.000000e+00> : vector<8xf32>
    %243 = vector.multi_reduction <add>, %242, %cst_78 [0] : vector<32x8xf32> to vector<8xf32>
    %244 = vector.shape_cast %243 : vector<8xf32> to vector<1x8xf32>
    %cst_79 = arith.constant 3.200000e+01 : f32
    %245 = vector.broadcast %cst_79 : f32 to vector<1x8xf32>
    %246 = arith.divf %244, %245 : vector<1x8xf32>
    %247 = vector.broadcast %239 : vector<1x8xf32> to vector<32x8xf32>
    %248 = arith.subf %235, %247 : vector<32x8xf32>
    %cst_80 = arith.constant 9.99999974E-6 : f32
    %249 = vector.broadcast %cst_80 : f32 to vector<1x8xf32>
    %250 = arith.addf %246, %249 : vector<1x8xf32>
    %251 = math.rsqrt %250 : vector<1x8xf32>
    %252 = vector.broadcast %251 : vector<1x8xf32> to vector<32x8xf32>
    %253 = arith.mulf %248, %252 : vector<32x8xf32>
    %254 = vector.broadcast %158 : vector<32x1xf32> to vector<32x8xf32>
    %255 = arith.mulf %253, %254 : vector<32x8xf32>
    %256 = vector.broadcast %159 : vector<32x1xf32> to vector<32x8xf32>
    %257 = arith.addf %255, %256 : vector<32x8xf32>
    %cst_81 = arith.constant dense<0.000000e+00> : vector<64x8xf32>
    %258 = tpu.matmul %150, %257, %cst_81 {dimension_numbers = #tpu.dot_dimension_numbers<[1], [0], [0], [1], [0, 0, 1, 1], [], []>} : vector<64x32xf32>, vector<32x8xf32>, vector<64x8xf32> -> vector<64x8xf32>
    %259 = vector.broadcast %164 : vector<64x1xf32> to vector<64x8xf32>
    %260 = arith.addf %258, %259 : vector<64x8xf32>
    %cst_82 = arith.constant 0.000000e+00 : f32
    %261 = vector.broadcast %cst_82 : f32 to vector<64x8xf32>
    %262 = arith.maximumf %260, %261 : vector<64x8xf32>
    %cst_83 = arith.constant dense<0.000000e+00> : vector<32x8xf32>
    %263 = tpu.matmul %152, %262, %cst_83 {dimension_numbers = #tpu.dot_dimension_numbers<[1], [0], [0], [1], [0, 0, 1, 1], [], []>} : vector<32x64xf32>, vector<64x8xf32>, vector<32x8xf32> -> vector<32x8xf32>
    %264 = vector.broadcast %160 : vector<32x1xf32> to vector<32x8xf32>
    %265 = arith.addf %263, %264 : vector<32x8xf32>
    %266 = arith.addf %265, %265 : vector<32x8xf32>
    %cst_84 = arith.constant dense<0.000000e+00> : vector<8xf32>
    %267 = vector.multi_reduction <add>, %266, %cst_84 [0] : vector<32x8xf32> to vector<8xf32>
    %268 = vector.shape_cast %267 : vector<8xf32> to vector<1x8xf32>
    %cst_85 = arith.constant 3.200000e+01 : f32
    %269 = vector.broadcast %cst_85 : f32 to vector<1x8xf32>
    %270 = arith.divf %268, %269 : vector<1x8xf32>
    %271 = vector.broadcast %270 : vector<1x8xf32> to vector<32x8xf32>
    %272 = arith.subf %266, %271 : vector<32x8xf32>
    %273 = arith.mulf %272, %272 : vector<32x8xf32>
    %cst_86 = arith.constant dense<0.000000e+00> : vector<8xf32>
    %274 = vector.multi_reduction <add>, %273, %cst_86 [0] : vector<32x8xf32> to vector<8xf32>
    %275 = vector.shape_cast %274 : vector<8xf32> to vector<1x8xf32>
    %cst_87 = arith.constant 3.200000e+01 : f32
    %276 = vector.broadcast %cst_87 : f32 to vector<1x8xf32>
    %277 = arith.divf %275, %276 : vector<1x8xf32>
    %278 = vector.broadcast %270 : vector<1x8xf32> to vector<32x8xf32>
    %279 = arith.subf %266, %278 : vector<32x8xf32>
    %cst_88 = arith.constant 9.99999974E-6 : f32
    %280 = vector.broadcast %cst_88 : f32 to vector<1x8xf32>
    %281 = arith.addf %277, %280 : vector<1x8xf32>
    %282 = math.rsqrt %281 : vector<1x8xf32>
    %283 = vector.broadcast %282 : vector<1x8xf32> to vector<32x8xf32>
    %284 = arith.mulf %279, %283 : vector<32x8xf32>
    %285 = vector.broadcast %161 : vector<32x1xf32> to vector<32x8xf32>
    %286 = arith.mulf %284, %285 : vector<32x8xf32>
    %287 = vector.broadcast %162 : vector<32x1xf32> to vector<32x8xf32>
    %288 = arith.addf %286, %287 : vector<32x8xf32>
    %c0_89 = arith.constant 0 : index
    %c0_90 = arith.constant 0 : index
    %289 = vector.load %arg7[%c0_89, %c0_90] : memref<32x8xf32, #tpu.memory_space<vmem>>, vector<32x8xf32>
    tpu.vector_store %arg7[%c0_89, %c0_90], %288 {strides = array<i32>} : memref<32x8xf32, #tpu.memory_space<vmem>>, vector<32x8xf32>,
    return
  }
}

</mosaic_0001>

<bundles_post_ra>
// kernel: encoder_forward.1
= control target key start
LH: loop header
LB: loop body
LE: loop exit
PB: predicated region body
PF: predicated region fallthrough
CT: control target
= control target key end

     0   :  { %vm134_vm0 = vcmask 261120   ;;  %v3272_v2 = vmov 0   ;;  %s3273_s24 = smov 4   ;;  %v3274_v32 = vmov 0.0   ;;  %vm3275_vm1 = vmmov 0   ;;  %s3276_s25 = smov 12   ;;  %s4067_s0 = inlined_call_operand.vmem [shape: f32[32,8], index: 0, kind: input, shape index: {}]   ;;  %s4068_s1 = inlined_call_operand.vmem [shape: f32[2,96,32], index: 1, kind: input, shape index: {}]   ;;  %s4069_s6 = inlined_call_operand.vmem [shape: f32[2,96,2], index: 6, kind: input, shape index: {}]   ;;  %s4070_s2 = inlined_call_operand.vmem [shape: f32[2,32,32], index: 2, kind: input, shape index: {}]   ;;  %s4071_s5 = inlined_call_operand.vmem [shape: f32[2,32,6], index: 5, kind: input, shape index: {}]   ;;  %s4072_s3 = inlined_call_operand.vmem [shape: f32[2,64,32], index: 3, kind: input, shape index: {}]   ;;  %s4073_s4 = inlined_call_operand.vmem [shape: f32[2,32,64], index: 4, kind: input, shape index: {}]   ;;  %s4074_s7 = inlined_call_operand.vmem [shape: f32[32,8], index: 7, kind: output, shape index: {}]  }
   0x1   :  { %v3328_v0 = vld [vmem:[%s4067_s0 + $0x18] sm:$0xff]  ;;  %v3333_v1 = vld [vmem:[%s4067_s0 + $0x10] sm:$0xff]  ;;  %3219 = vset.pattern.permute.xlu1 %v3272_v2  ;;  %3218 = vset.pattern.permute.xlu0 %v3272_v2  ;;  %v30_v3 = vld [vmem:[%s4068_s1] sm:$0xff]  ;;  %s3277_s26 = smov 8   ;;  %vm310_vm2 = vcmask 64512   ;;  %vm308_vm3 = vcmask 31744  }
   0x2   :  { %2997 = vmatprep.subr.mxu0 %v3328_v0  ;;  %v3345_v4 = vld [vmem:[%s4067_s0 + $0x8] sm:$0xff]  ;;  %3005 = vmatprep.mubr.msk.f32.mxu0 %vm134_vm0, %v30_v3  ;;  %v3353_v5 = vld [vmem:[%s4067_s0] sm:$0xff]  ;;  %v3358_v6 = vld [vmem:[%s4069_s6 + $0x38] sm:$0xff]  ;;  %vm312_vm4 = vcmask 97280   ;;  %vm329_vm5 = vcmask 130048   ;;  %s3278_s12 = smov 124  }
   0x3   :  { %2998 = vmatpush3.msra.mxu0 %v3328_v0  ;;  %v3363_v7 = vld [vmem:[%s4069_s6 + $0x28] sm:$0xff]  ;;  %111 = vperm.xlu1 %3219, %v3358_v6   ;;  %v32_v10 = vld [vmem:[%s4068_s1 + $0x10] sm:$0xff]  ;;  %v33_v12 = vld [vmem:[%s4068_s1 + $0x18] sm:$0xff]  ;;  %s3279_s15 = smov 112   ;;  %vm1206_vm6 = vcmask 523264  }
   0x4   :  { %2999 = vmatprep.subr.mxu0 %v3333_v1  ;;  %v31_v8 = vld [vmem:[%s4068_s1 + $0x8] sm:$0xff]  ;;  %101 = vperm.xlu0 %3218, %v3363_v7   ;;  %v3384_v11 = vld [vmem:[%s4069_s6 + $0x30] sm:$0xff]  ;;  %v3396_v13 = vld [vmem:[%s4069_s6 + $0x18] sm:$0xff] }
   0x5   :  { %3000 = vmatpush3.msra.mxu0 %v3333_v1  ;;  %v3374_v9 = vld [vmem:[%s4069_s6 + $0x8] sm:$0xff]  ;;  %v34_v14 = vld [vmem:[%s4068_s1 + $0x20] sm:$0xff]  ;;  %v3405_v15 = vld [vmem:[%s4069_s6 + $0x10] sm:$0xff]  ;;  %3023 = vmatprep.subr.mxu1 %v3274_v32 }
   0x6   :  { %3001 = vmatprep.subr.mxu0 %v3345_v4  ;;  %v35_v16 = vld [vmem:[%s4068_s1 + $0x28] sm:$0xff]  ;;  %v3416_v17 = vld [vmem:[%s4069_s6] sm:$0xff]  ;;  %v36_v18 = vld [vmem:[%s4068_s1 + $0x30] sm:$0xff]  ;;  %3025 = vmatprep.mubr.msk.f32.mxu1 %vm3275_vm1, %v3274_v32 }
   0x7   :  { %3002 = vmatpush3.msra.mxu0 %v3345_v4  ;;  %81 = vperm.xlu1 %3219, %v3374_v9   ;;  %v3425_v19 = vld [vmem:[%s4069_s6 + $0x20] sm:$0xff]  ;;  %v37_v20 = vld [vmem:[%s4068_s1 + $0x38] sm:$0xff]  ;;  %v39_v22 = vld [vmem:[%s4068_s1 + $0x48] sm:$0xff] }
   0x8   :  { %3003 = vmatprep.subr.mxu0 %v3353_v5  ;;  %106 = vperm.xlu0 %3218, %v3384_v11   ;;  %v38_v21 = vld [vmem:[%s4068_s1 + $0x40] sm:$0xff]  ;;  %v40_v23 = vld [vmem:[%s4068_s1 + $0x50] sm:$0xff]  ;;  %v41_v24 = vld [vmem:[%s4068_s1 + $0x58] sm:$0xff] }
   0x9   :  { %3004 = vmatpush3.msra.mxu0 %v3353_v5  ;;  %v71_v46 = vld [vmem:[%s4069_s6 + $0x48] sm:$0xff]  ;;  %v72_v47 = vld [vmem:[%s4069_s6 + $0x50] sm:$0xff]  ;;  %v73_v48 = vld [vmem:[%s4069_s6 + $0x58] sm:$0xff] }
   0xa   :  { %3006 = vmatmul.mubr.msk.f32.vlgmr.msra.gmra.mxu0 %vm134_vm0, %v31_v8 }
   0xb   :  { %3008 = vmatprep.mubr.msk.f32.mxu0 %vm134_vm0, %v32_v10  ;;  %91 = vperm.xlu1 %3219, %v3396_v13  }
   0xc   :  { %86 = vperm.xlu0 %3218, %v3405_v15  }
   0xe   :  { %3009 = vmatmul.mubr.msk.f32.gmra.mxu0 %vm134_vm0, %v33_v12 }
   0xf   :  { %3011 = vmatprep.mubr.msk.f32.mxu0 %vm134_vm0, %v34_v14  ;;  %76 = vperm.xlu1 %3219, %v3416_v17  }
  0x10   :  { %96 = vperm.xlu0 %3218, %v3425_v19  }
  0x12   :  { %3012 = vmatmul.mubr.msk.f32.gmra.mxu0 %vm134_vm0, %v35_v16 }
  0x13   :  { %3014 = vmatprep.mubr.msk.f32.mxu0 %vm134_vm0, %v36_v18 }
  0x16   :  { %3015 = vmatmul.mubr.msk.f32.gmra.mxu0 %vm134_vm0, %v37_v20 }
  0x17   :  { %3017 = vmatprep.mubr.msk.f32.mxu0 %vm134_vm0, %v38_v21 }
  0x1a   :  { %3018 = vmatmul.mubr.msk.f32.gmra.mxu0 %vm134_vm0, %v39_v22 }
  0x1b   :  { %3020 = vmatprep.mubr.msk.f32.mxu0 %vm134_vm0, %v40_v23 }
  0x1e   :  { %3021 = vmatmul.mubr.msk.f32.gmra.mxu0 %vm134_vm0, %v41_v24  ;;  %v70_v24 = vld [vmem:[%s4069_s6 + $0x40] sm:$0xff] }
  0x7e   :  { %v112_v25 = vpop.permute.xlu1 %111 }
  0x7f   :  { %v102_v29 = vpop.permute.xlu0 %101 }
  0x82   :  { %v82_v26 = vpop.permute.xlu1 %81 }
  0x83   :  { %v107_v34 = vpop.permute.xlu0 %106 }
  0x86   :  { %v92_v44 = vpop.permute.xlu1 %91 }
  0x87   :  { %v87_v40 = vpop.permute.xlu0 %86 }
  0x8a   :  { %v77_v50 = vpop.permute.xlu1 %76 }
  0x8b   :  { %v97_v49 = vpop.permute.xlu0 %96 }
  0xca   :  { %v3007_v27 = vpop.f32.mrf.mxu0 }
  0xcb   :  { %v3451_v28 = vadd.f32 %v3007_v27, %v82_v26 }
  0xcc   :  { %v237_v30 = vpop.f32.mrf.mxu0 }
  0xcd   :  { %297 = vrot.lane.b32.xlu1 %v3451_v28, %s3273_s24  ;;  %v238_v55 = vadd.f32 %v237_v30, %v77_v50 }
  0xce   :  { %v3010_v31 = vpop.f32.mrf.mxu0 }
  0xcf   :  { %v253_v45 = vadd.f32 %v3010_v31, %v92_v44 }
  0xd0   :  { %v247_v33 = vpop.f32.mrf.mxu0 }
  0xd1   :  { %v3463_v43 = vadd.f32 %v247_v33, %v87_v40 }
  0xd2   :  { %v3013_v35 = vpop.f32.mrf.mxu0 }
  0xd3   :  { %v3458_v36 = vadd.f32 %v3013_v35, %v102_v29 }
  0xd4   :  { %v257_v37 = vpop.f32.mrf.mxu0 }
  0xd5   :  { %315 = vrot.lane.b32.xlu0 %v3458_v36, %s3273_s24  ;;  %v258_v53 = vadd.f32 %v257_v37, %v97_v49 }
  0xd6   :  { %v3016_v38 = vpop.f32.mrf.mxu0 }
  0xd7   :  { %v273_v39 = vadd.f32 %v3016_v38, %v112_v25 }
  0xd8   :  { %v267_v41 = vpop.f32.mrf.mxu0 }
  0xd9   :  { %v268_v42 = vadd.f32 %v267_v41, %v107_v34  ;;  %323 = vrot.lane.b32.xlu0 %v273_v39, %s3276_s25 }
  0xda   :  { %v3019_v8 = vpop.f32.mrf.mxu0 }
  0xdb   :  { %319 = vrot.lane.b32.xlu1 %v268_v42, %s3277_s26 }
  0xdc   :  { %v277_v21 = vpop.f32.mrf.mxu0 }
  0xdd   :  { %301 = vrot.lane.b32.xlu0 %v3463_v43, %s3277_s26 }
  0xde   :  { %v3022_v22 = vpop.f32.mrf.mxu0 }
  0xdf   :  { %305 = vrot.lane.b32.xlu1 %v253_v45, %s3276_s25 }
  0xe0   :  { %v287_v25 = vpop.f32.mrf.mxu0 }
  0xe3   :  { %121 = vperm.xlu1 %3219, %v71_v46  }
  0xe7   :  { %126 = vperm.xlu1 %3219, %v72_v47  }
  0xeb   :  { %131 = vperm.xlu1 %3219, %v73_v48  }
 0x13f   :  { %v298_v52 = vpop.permute.xlu1 %297 }
 0x140   :  { %v309_v59 = vsel %vm308_vm3, %v238_v55, %v298_v52 }
 0x147   :  { %v316_v51 = vpop.permute.xlu0 %315 }
 0x148   :  { %v326_v56 = vsel %vm308_vm3, %v258_v53, %v316_v51 }
 0x14b   :  { %v324_v54 = vpop.permute.xlu0 %323 }
 0x14d   :  { %v320_v57 = vpop.permute.xlu1 %319 }
 0x14e   :  { %v327_v58 = vsel %vm310_vm2, %v326_v56, %v320_v57 }
 0x14f   :  { %v302_v60 = vpop.permute.xlu0 %301  ;;  %v328_v61 = vsel %vm312_vm4, %v327_v58, %v324_v54 }
 0x150   :  { %v311_v62 = vsel %vm310_vm2, %v309_v59, %v302_v60  ;;  %3024 = vmatpush3.xpose.msk.msra.mxu1 %vm329_vm5, %v328_v61 }
 0x151   :  { %v306_v63 = vpop.permute.xlu1 %305  ;;  %3028 = vmatprep.subr.mxu1 %v3274_v32 }
 0x152   :  { %v313_v3 = vsel %vm312_vm4, %v311_v62, %v306_v63 }
 0x153   :  { %3026 = vmatmul.mubr.msk.f32.vlgmr.msra.gmra.mxu1 %vm329_vm5, %v313_v3  ;;  %v3535_v3 = vld [vmem:[%s4070_s2 + $0x8] sm:$0xff] }
 0x154   :  { %3030 = vmatprep.mubr.msk.f32.mxu1 %vm3275_vm1, %v3274_v32 }
 0x15e   :  { %v122_v10 = vpop.permute.xlu1 %121 }
 0x15f   :  { %v3489_v12 = vadd.f32 %v3019_v8, %v122_v10  ;;  %v3542_v8 = vld [vmem:[%s4070_s2 + $0x18] sm:$0xff]  ;;  %v3549_v10 = vld [vmem:[%s4071_s5 + $0x8] sm:$0xff] }
 0x161   :  { %419 = vrot.lane.b32.xlu1 %v3489_v12, %s3273_s24 }
 0x162   :  { %v127_v23 = vpop.permute.xlu1 %126 }
 0x163   :  { %v288_v26 = vadd.f32 %v287_v25, %v127_v23  ;;  %v42_v23 = vld [vmem:[%s4070_s2] sm:$0xff] }
 0x164   :  { %v3571_v25 = vld [vmem:[%s4071_s5] sm:$0xff] }
 0x165   :  { %526 = vrot.lane.b32.xlu1 %v273_v39, %s3277_s26 }
 0x166   :  { %v132_v27 = vpop.permute.xlu1 %131 }
 0x167   :  { %v293_v29 = vadd.f32 %v3022_v22, %v132_v27 }
 0x1d3   :  { %v420_v37 = vpop.permute.xlu1 %419 }
 0x213   :  { %v402_v14 = vpop.f32.mrf.mxu1 }
 0x214   :  { %v406_v16 = vmul.f32 0.25, %v402_v14  ;;  %v3555_v14 = vld [vmem:[%s4071_s5 + $0x18] sm:$0xff] }
 0x215   :  { %v3027_v18 = vpop.f32.mrf.mxu1 }
 0x216   :  { %v407_v20 = vsel %vm310_vm2, %v406_v16, -inf }
 0x217   :  { %408 = vmax.xlane.f32.xlu0 %v407_v20 }
 0x22d   :  { %116 = vperm.xlu0 %3218, %v70_v24   ;;  %v44_v24 = vld [vmem:[%s4070_s2 + $0x10] sm:$0xff] }
 0x231   :  { %423 = vrot.lane.b32.xlu0 %v288_v26, %s3277_s26 }
 0x235   :  { %427 = vrot.lane.b32.xlu0 %v293_v29, %s3276_s25 }
 0x239   :  { %520 = vrot.lane.b32.xlu0 %v258_v53, %s3278_s12 }
 0x23d   :  { %523 = vrot.lane.b32.xlu0 %v268_v42, %s3273_s24 }
 0x241   :  { %507 = vrot.lane.b32.xlu0 %v238_v55, %s3278_s12 }
 0x245   :  { %513 = vrot.lane.b32.xlu0 %v253_v45, %s3277_s26  ;;  %v527_v45 = vpop.permute.xlu1 %526 }
 0x2a0   :  { %v409_v30 = vpop.xlane.xlu0 %408 }
 0x2a1   :  { %v410_v31 = vsub.f32 %v406_v16, %v409_v30 }
 0x2a3   :  { %v411_v33 = vmul.f32 1.442695, %v410_v31 }
 0x2a5   :  { %3248 = vpow2.f32 %v411_v33 }
 0x2a8   :  { %v117_v34 = vpop.permute.xlu0 %116 }
 0x2a9   :  { %v278_v35 = vadd.f32 %v277_v21, %v117_v34 }
 0x2ab   :  { %v430_v39 = vsel %vm308_vm3, %v278_v35, %v420_v37 }
 0x2ac   :  { %v424_v38 = vpop.permute.xlu0 %423 }
 0x2ad   :  { %v431_v40 = vsel %vm310_vm2, %v430_v39, %v424_v38 }
 0x2b0   :  { %v428_v41 = vpop.permute.xlu0 %427 }
 0x2b1   :  { %v432_v44 = vsel %vm312_vm4, %v431_v40, %v428_v41  ;;  %v3280_v40 = vmov 1  }
 0x2b2   :  { %v3249_v42 = vpop.eup %3248  ;;  %3029 = vmatpush3.msra.mxu1 %v432_v44 }
 0x2b3   :  { %v413_v46 = vsel %vm310_vm2, %v3249_v42, 0.0  ;;  %3033 = vmatprep.subr.mxu1 %v3274_v32 }
 0x2b4   :  { %414 = vadd.xlane.f32.xlu1 %v413_v46  ;;  %v521_v48 = vpop.permute.xlu0 %520 }
 0x2b5   :  { %v529_v50 = vsel %vm308_vm3, %v521_v48, %v3458_v36 }
 0x2b8   :  { %v524_v49 = vpop.permute.xlu0 %523 }
 0x2b9   :  { %v530_v53 = vsel %vm310_vm2, %v529_v50, %v524_v49 }
 0x2ba   :  { %v531_v57 = vsel %vm312_vm4, %v530_v53, %v527_v45 }
 0x2bc   :  { %v508_v51 = vpop.permute.xlu0 %507 }
 0x2bd   :  { %v516_v56 = vsel %vm308_vm3, %v508_v51, %v3451_v28 }
 0x2c0   :  { %v514_v36 = vpop.permute.xlu0 %513 }
 0x2c5   :  { %510 = vrot.lane.b32.xlu1 %v3463_v43, %s3273_s24 }
 0x33d   :  { %v415_v47 = vpop.xlane.xlu1 %414 }
 0x33e   :  { %3250 = vrcp.f32 %v415_v47 }
 0x341   :  { %v511_v54 = vpop.permute.xlu1 %510 }
 0x342   :  { %v517_v43 = vsel %vm310_vm2, %v516_v56, %v511_v54 }
 0x343   :  { %v518_v58 = vsel %vm312_vm4, %v517_v43, %v514_v36 }
 0x34b   :  { %v3251_v52 = vpop.eup %3250 }
 0x34c   :  { %v417_v55 = vmul.f32 %v3251_v52, %v3249_v42 }
 0x34e   :  { %3031 = vmatmul.mubr.msk.f32.vlgmr.msra.gmra.mxu1 %vm310_vm2, %v417_v55 }
 0x34f   :  { %3034 = vmatpush3.xpose.msk.msra.mxu1 %vm329_vm5, %v531_v57  ;;  %3035 = vmatprep.mubr.msk.f32.mxu1 %vm3275_vm1, %v3274_v32 }
 0x350   :  { %3038 = vmatprep.subr.mxu1 %v3274_v32 }
 0x352   :  { %3036 = vmatmul.mubr.msk.f32.vlgmr.msra.gmra.mxu1 %vm329_vm5, %v518_v58 }
 0x353   :  { %3040 = vmatprep.mubr.msk.f32.mxu1 %vm3275_vm1, %v3274_v32 }
 0x40e   :  { %v3527_v28 = vpop.f32.mrf.mxu1 }
 0x410   :  { %v3032_v59 = vpop.f32.mrf.mxu1 }
 0x412   :  { %v604_v60 = vpop.f32.mrf.mxu1 }
 0x413   :  { %v608_v61 = vmul.f32 0.25, %v604_v60 }
 0x414   :  { %v3037_v62 = vpop.f32.mrf.mxu1 }
 0x415   :  { %v609_v63 = vsel %vm310_vm2, %v608_v61, -inf }
 0x416   :  { %610 = vmax.xlane.f32.xlu1 %v609_v63 }
 0x427   :  { %624 = vrot.lane.b32.xlu1 %v288_v26, %s3273_s24  ;;  %v3577_v26 = vld [vmem:[%s4071_s5 + $0x10] sm:$0xff] }
 0x42b   :  { %627 = vrot.lane.b32.xlu1 %v293_v29, %s3277_s26 }
 0x42f   :  { %712 = vrot.lane.b32.xlu1 %v3535_v3, %s3279_s15 }
 0x433   :  { %716 = vrot.lane.b32.xlu1 %v3542_v8, %s3279_s15 }
 0x437   :  { %917 = vperm.xlu1 %3219, %v3549_v10  }
 0x43b   :  { %927 = vperm.xlu1 %3219, %v3555_v14  }
 0x43f   :  { %3221 = vset.pattern.permute.xlu1 %v3280_v40 }
 0x440   :  { %990 = vperm.xlu1 %3221, %v3577_v26  }
 0x49f   :  { %v611_v16 = vpop.xlane.xlu1 %610 }
 0x4a0   :  { %v612_v18 = vsub.f32 %v608_v61, %v611_v16 }
 0x4a2   :  { %v613_v20 = vmul.f32 1.442695, %v612_v18 }
 0x4a3   :  { %v625_v27 = vpop.permute.xlu1 %624 }
 0x4a4   :  { %3252 = vpow2.f32 %v613_v20 }
 0x4a7   :  { %v628_v33 = vpop.permute.xlu1 %627 }
 0x4ab   :  { %v713_v44 = vpop.permute.xlu1 %712 }
 0x4b1   :  { %v3253_v21 = vpop.eup %3252 }
 0x4b2   :  { %v615_v22 = vsel %vm310_vm2, %v3253_v21, 0.0 }
 0x4b3   :  { %616 = vadd.xlane.f32.xlu0 %v615_v22 }
 0x4c9   :  { %621 = vrot.lane.b32.xlu0 %v278_v35, %s3278_s12 }
 0x4cd   :  { %710 = vrot.lane.b32.xlu0 %v42_v23, %s3279_s15 }
 0x4d1   :  { %714 = vrot.lane.b32.xlu0 %v44_v24, %s3279_s15 }
 0x4d5   :  { %912 = vperm.xlu0 %3218, %v3571_v25  }
 0x4d9   :  { %922 = vperm.xlu0 %3218, %v3577_v26  }
 0x4dd   :  { %3220 = vset.pattern.permute.xlu0 %v3280_v40 }
 0x4de   :  { %994 = vperm.xlu0 %3220, %v3555_v14  }
 0x4e2   :  { %986 = vperm.xlu0 %3220, %v3549_v10  }
 0x4e6   :  { %982 = vperm.xlu0 %3220, %v3571_v25  }
 0x53c   :  { %v617_v29 = vpop.xlane.xlu0 %616 }
 0x53d   :  { %3254 = vrcp.f32 %v617_v29 }
 0x540   :  { %v622_v30 = vpop.permute.xlu0 %621 }
 0x541   :  { %v630_v31 = vsel %vm308_vm3, %v622_v30, %v3489_v12  ;;  %v3281_v12 = vmov 2  }
 0x542   :  { %v631_v34 = vsel %vm310_vm2, %v630_v31, %v625_v27  ;;  %3222 = vset.pattern.permute.xlu1 %v3281_v12  ;;  %3223 = vset.pattern.permute.xlu0 %v3281_v12 }
 0x543   :  { %v632_v35 = vsel %vm312_vm4, %v631_v34, %v628_v33  ;;  %1014 = vperm.xlu1 %3222, %v3555_v14   ;;  %1002 = vperm.xlu0 %3223, %v3571_v25  }
 0x544   :  { %3039 = vmatpush3.msra.mxu1 %v632_v35  ;;  %v711_v39 = vpop.permute.xlu0 %710 }
 0x547   :  { %1010 = vperm.xlu1 %3222, %v3577_v26   ;;  %3225 = vset.pattern.permute.xlu0 %v3280_v40 }
 0x548   :  { %1042 = vperm.xlu0 %3225, %v3363_v7   ;;  %v717_v7 = vpop.permute.xlu1 %716 }
 0x54a   :  { %v3255_v37 = vpop.eup %3254 }
 0x54b   :  { %v619_v38 = vmul.f32 %v3255_v37, %v3253_v21  ;;  %1006 = vperm.xlu1 %3222, %v3549_v10  }
 0x54c   :  { %1030 = vperm.xlu0 %3225, %v3405_v15  }
 0x54d   :  { %3041 = vmatmul.mubr.msk.f32.vlgmr.msra.gmra.mxu1 %vm310_vm2, %v619_v38 }
 0x54e   :  { %3045 = vmatprep.mubr.msk.f32.mxu1 %vm329_vm5, %v711_v39 }
 0x54f   :  { %3224 = vset.pattern.permute.xlu1 %v3280_v40 }
 0x550   :  { %1050 = vperm.xlu1 %3224, %v3358_v6   ;;  %1022 = vperm.xlu0 %3225, %v3416_v17   ;;  %v715_v6 = vpop.permute.xlu0 %714 }
 0x554   :  { %1046 = vperm.xlu1 %3224, %v3384_v11   ;;  %v913_v47 = vpop.permute.xlu0 %912 }
 0x558   :  { %1038 = vperm.xlu1 %3224, %v3425_v19   ;;  %v918_v19 = vpop.permute.xlu1 %917  ;;  %v923_v58 = vpop.permute.xlu0 %922 }
 0x55c   :  { %1034 = vperm.xlu1 %3224, %v3396_v13   ;;  %v928_v54 = vpop.permute.xlu1 %927 }
 0x560   :  { %1026 = vperm.xlu1 %3224, %v3374_v9   ;;  %v46_v9 = vld [vmem:[%s4072_s3] sm:$0xff] }
 0x561   :  { %3067 = vmatprep.mubr.msk.f32.mxu0 %vm134_vm0, %v46_v9 }
 0x60d   :  { %v702_v41 = vpop.f32.mrf.mxu1 }
 0x60e   :  { %3043 = vmatprep.subr.msk.mxu1 %vm329_vm5, %v702_v41 }
 0x60f   :  { %v3042_v42 = vpop.f32.mrf.mxu1  ;;  %3044 = vmatpush3.xpose.msk.msra.mxu1 %vm329_vm5, %v702_v41 }
 0x610   :  { %3051 = vmatprep.subr.msk.mxu1 %vm329_vm5, %v3527_v28 }
 0x612   :  { %3046 = vmatmul.mubr.msk.f32.vlgmr.msra.gmra.mxu1 %vm329_vm5, %v713_v44 }
 0x613   :  { %3052 = vmatpush3.xpose.msk.msra.mxu1 %vm329_vm5, %v3527_v28  ;;  %3048 = vmatprep.mubr.msk.f32.mxu1 %vm329_vm5, %v715_v6 }
 0x616   :  { %3049 = vmatmul.mubr.msk.f32.gmra.mxu1 %vm329_vm5, %v717_v7 }
 0x617   :  { %3053 = vmatprep.mubr.msk.f32.mxu1 %vm329_vm5, %v42_v23 }
 0x61a   :  { %3054 = vmatmul.mubr.msk.f32.vlgmr.msra.gmra.mxu1 %vm329_vm5, %v3535_v3 }
 0x61b   :  { %3056 = vmatprep.mubr.msk.f32.mxu1 %vm329_vm5, %v44_v24 }
 0x61e   :  { %3057 = vmatmul.mubr.msk.f32.gmra.mxu1 %vm329_vm5, %v3542_v8 }
 0x6d2   :  { %v3047_v11 = vpop.f32.mrf.mxu1 }
 0x6d4   :  { %v795_v13 = vpop.f32.mrf.mxu1 }
 0x6d6   :  { %v3050_v15 = vpop.f32.mrf.mxu1 }
 0x6d8   :  { %v805_v17 = vpop.f32.mrf.mxu1 }
 0x6da   :  { %v3055_v46 = vpop.f32.mrf.mxu1 }
 0x6db   :  { %v897_v45 = vadd.f32 %v3055_v46, %v3047_v11  ;;  %v991_v46 = vpop.permute.xlu1 %990 }
 0x6dc   :  { %v891_v48 = vpop.f32.mrf.mxu1 }
 0x6dd   :  { %v931_v49 = vadd.f32 %v918_v19, %v897_v45  ;;  %v892_v50 = vadd.f32 %v891_v48, %v795_v13  ;;  %v995_v45 = vpop.permute.xlu0 %994 }
 0x6de   :  { %v3058_v51 = vpop.f32.mrf.mxu1 }
 0x6df   :  { %v930_v52 = vadd.f32 %v913_v47, %v892_v50  ;;  %v907_v53 = vadd.f32 %v3058_v51, %v3050_v15  ;;  %v935_v56 = vadd.f32 %v931_v49, %v3345_v4  ;;  %v1015_v47 = vpop.permute.xlu1 %1014 }
 0x6e0   :  { %v901_v55 = vpop.f32.mrf.mxu1 }
 0x6e1   :  { %v934_v57 = vadd.f32 %v930_v52, %v3353_v5  ;;  %v933_v43 = vadd.f32 %v928_v54, %v907_v53  ;;  %v902_v36 = vadd.f32 %v901_v55, %v805_v17  ;;  %v939_v60 = vsel %vm310_vm2, %v935_v56, 0.0  ;;  %v987_v48 = vpop.permute.xlu0 %986 }
 0x6e3   :  { %v938_v28 = vsel %vm310_vm2, %v934_v57, 0.0  ;;  %v932_v59 = vadd.f32 %v923_v58, %v902_v36  ;;  %v937_v61 = vadd.f32 %v933_v43, %v3328_v0  ;;  %v1011_v53 = vpop.permute.xlu1 %1010 }
 0x6e4   :  { %v940_v63 = vadd.f32 %v939_v60, %v938_v28 }
 0x6e5   :  { %v936_v62 = vadd.f32 %v932_v59, %v3333_v1  ;;  %v943_v4 = vsel %vm310_vm2, %v937_v61, 0.0 }
 0x6e7   :  { %v941_v3 = vsel %vm310_vm2, %v936_v62, 0.0  ;;  %v1007_v60 = vpop.permute.xlu1 %1006 }
 0x6e8   :  { %v942_v8 = vadd.f32 %v941_v3, %v940_v63  ;;  %v47_v63 = vld [vmem:[%s4072_s3 + $0x8] sm:$0xff]  ;;  %v48_v3 = vld [vmem:[%s4072_s3 + $0x10] sm:$0xff] }
 0x6ea   :  { %v944_v16 = vadd.f32 %v943_v4, %v942_v8  ;;  %v49_v8 = vld [vmem:[%s4072_s3 + $0x18] sm:$0xff]  ;;  %v50_v4 = vld [vmem:[%s4072_s3 + $0x20] sm:$0xff] }
 0x6ec   :  { %v945_v5 = vrot.slane %v944_v16, 4 }
 0x6ee   :  { %v946_v18 = vadd.f32 %v945_v5, %v944_v16  ;;  %v51_v16 = vld [vmem:[%s4072_s3 + $0x28] sm:$0xff]  ;;  %v52_v5 = vld [vmem:[%s4072_s3 + $0x30] sm:$0xff] }
 0x6f0   :  { %v947_v20 = vrot.slane %v946_v18, 2 }
 0x6f2   :  { %v948_v21 = vadd.f32 %v947_v20, %v946_v18  ;;  %v53_v18 = vld [vmem:[%s4072_s3 + $0x38] sm:$0xff]  ;;  %v54_v20 = vld [vmem:[%s4073_s4] sm:$0xff] }
 0x6f3   :  { %3095 = vmatprep.mubr.msk.f32.mxu1 %vm1206_vm6, %v54_v20 }
 0x6f4   :  { %v949_v22 = vrot.slane %v948_v21, 1 }
 0x6f6   :  { %v950_v23 = vadd.f32 %v949_v22, %v948_v21  ;;  %v3282_v21 = vmov 3   ;;  %v3283_v22 = vmov 4  }
 0x6f7   :  { %3226 = vset.pattern.permute.xlu1 %v3282_v21  ;;  %3227 = vset.pattern.permute.xlu0 %v3282_v21 }
 0x6f8   :  { %v952_v24 = vmul.f32 0.03125, %v950_v23  ;;  %1191 = vperm.xlu1 %3226, %v3571_v25   ;;  %1195 = vperm.xlu0 %3227, %v3549_v10   ;;  %v3284_v23 = vmov 5  }
 0x6fa   :  { %v953_v27 = vsub.f32 %v934_v57, %v952_v24  ;;  %v955_v29 = vsub.f32 %v936_v62, %v952_v24  ;;  %v954_v30 = vsub.f32 %v935_v56, %v952_v24  ;;  %v956_v0 = vsub.f32 %v937_v61, %v952_v24  ;;  %v983_v57 = vpop.permute.xlu0 %982  ;;  %v1051_v24 = vpop.permute.xlu1 %1050 }
 0x6fc   :  { %v959_v31 = vmul.f32 %v955_v29, %v955_v29  ;;  %v957_v1 = vmul.f32 %v953_v27, %v953_v27  ;;  %v958_v33 = vmul.f32 %v954_v30, %v954_v30  ;;  %v960_v34 = vmul.f32 %v956_v0, %v956_v0  ;;  %1199 = vperm.xlu1 %3226, %v3577_v26  }
 0x6fd   :  { %3228 = vset.pattern.permute.xlu0 %v3283_v22 }
 0x6fe   :  { %v961_v35 = vsel %vm310_vm2, %v957_v1, 0.0  ;;  %v962_v37 = vsel %vm310_vm2, %v958_v33, 0.0  ;;  %v964_v39 = vsel %vm310_vm2, %v959_v31, 0.0  ;;  %v966_v44 = vsel %vm310_vm2, %v960_v34, 0.0  ;;  %v1003_v59 = vpop.permute.xlu0 %1002  ;;  %1363 = vperm.xlu0 %3228, %v3555_v14  }
 0x6ff   :  { %v963_v38 = vadd.f32 %v962_v37, %v961_v35 }
 0x700   :  { %1203 = vperm.xlu1 %3226, %v3555_v14  }
 0x701   :  { %v965_v41 = vadd.f32 %v964_v39, %v963_v38 }
 0x702   :  { %1355 = vperm.xlu0 %3228, %v3549_v10   ;;  %v1043_v34 = vpop.permute.xlu0 %1042 }
 0x703   :  { %v967_v42 = vadd.f32 %v966_v44, %v965_v41 }
 0x704   :  { %3229 = vset.pattern.permute.xlu1 %v3283_v22 }
 0x705   :  { %v968_v6 = vrot.slane %v967_v42, 4  ;;  %1359 = vperm.xlu1 %3229, %v3577_v26  }
 0x706   :  { %1351 = vperm.xlu0 %3228, %v3571_v25  }
 0x707   :  { %v969_v7 = vadd.f32 %v968_v6, %v967_v42 }
 0x709   :  { %v970_v9 = vrot.slane %v969_v7, 2  ;;  %3230 = vset.pattern.permute.xlu1 %v3284_v23 }
 0x70a   :  { %3231 = vset.pattern.permute.xlu0 %v3284_v23  ;;  %1383 = vperm.xlu1 %3230, %v3555_v14  }
 0x70b   :  { %v971_v11 = vadd.f32 %v970_v9, %v969_v7  ;;  %1371 = vperm.xlu0 %3231, %v3571_v25  }
 0x70d   :  { %v972_v13 = vrot.slane %v971_v11, 1 }
 0x70e   :  { %1379 = vperm.xlu1 %3230, %v3577_v26  }
 0x70f   :  { %v973_v15 = vadd.f32 %v972_v13, %v971_v11  ;;  %3233 = vset.pattern.permute.xlu0 %v3272_v2 }
 0x711   :  { %v974_v17 = vmul.f32 0.03125, %v973_v15 }
 0x712   :  { %1375 = vperm.xlu1 %3230, %v3549_v10   ;;  %v1031_v10 = vpop.permute.xlu0 %1030 }
 0x713   :  { %v975_v19 = vadd.f32 1e-05, %v974_v17 }
 0x715   :  { %3256 = vrsqrt.f32 %v975_v19 }
 0x716   :  { %3232 = vset.pattern.permute.xlu1 %v3272_v2  ;;  %v1023_v13 = vpop.permute.xlu0 %1022 }
 0x722   :  { %v3257_v49 = vpop.eup %3256 }
 0x723   :  { %v980_v50 = vmul.f32 %v3257_v49, %v956_v0  ;;  %v979_v51 = vmul.f32 %v3257_v49, %v955_v29  ;;  %v978_v52 = vmul.f32 %v3257_v49, %v954_v30  ;;  %v977_v56 = vmul.f32 %v3257_v49, %v953_v27  ;;  %v1047_v29 = vpop.permute.xlu1 %1046  ;;  %v56_v49 = vld [vmem:[%s4073_s4 + $0x10] sm:$0xff] }
 0x725   :  { %v1000_v54 = vmul.f32 %v995_v45, %v980_v50  ;;  %v999_v55 = vmul.f32 %v991_v46, %v979_v51  ;;  %v998_v43 = vmul.f32 %v987_v48, %v978_v52  ;;  %v997_v58 = vmul.f32 %v983_v57, %v977_v56  ;;  %v55_v48 = vld [vmem:[%s4073_s4 + $0x8] sm:$0xff]  ;;  %v57_v50 = vld [vmem:[%s4073_s4 + $0x18] sm:$0xff]  ;;  %v2797_v51 = vld [vmem:[%s4068_s1 + $0x60] sm:$0xff] }
 0x726   :  { %v3713_v52 = vld [vmem:[%s4069_s6 + $0x88] sm:$0xff]  ;;  %v3742_v57 = vld [vmem:[%s4069_s6 + $0x60] sm:$0xff] }
 0x727   :  { %v1020_v36 = vadd.f32 %v1015_v47, %v1000_v54  ;;  %v1019_v28 = vadd.f32 %v1011_v53, %v999_v55  ;;  %v1018_v61 = vadd.f32 %v1007_v60, %v998_v43  ;;  %v1017_v62 = vadd.f32 %v1003_v59, %v997_v58  ;;  %v1039_v1 = vpop.permute.xlu1 %1038  ;;  %1467 = vperm.xlu1 %3232, %v3713_v52   ;;  %v3719_v53 = vld [vmem:[%s4069_s6 + $0x98] sm:$0xff]  ;;  %v3724_v54 = vld [vmem:[%s4069_s6 + $0x90] sm:$0xff]  ;;  %v3736_v56 = vld [vmem:[%s4069_s6 + $0x68] sm:$0xff] }
 0x728   :  { %1477 = vperm.xlu0 %3233, %v3719_v53   ;;  %v3730_v55 = vld [vmem:[%s4069_s6 + $0x78] sm:$0xff]  ;;  %v3748_v43 = vld [vmem:[%s4069_s6 + $0x70] sm:$0xff] }
 0x729   :  { %3059 = vmatprep.subr.mxu0 %v1020_v36 }
 0x72a   :  { %3060 = vmatpush3.msra.mxu0 %v1020_v36  ;;  %v3755_v36 = vld [vmem:[%s4069_s6 + $0x80] sm:$0xff] }
 0x72b   :  { %3061 = vmatprep.subr.mxu0 %v1019_v28  ;;  %v1035_v37 = vpop.permute.xlu1 %1034  ;;  %1472 = vperm.xlu1 %3232, %v3724_v54  }
 0x72c   :  { %3062 = vmatpush3.msra.mxu0 %v1019_v28  ;;  %1457 = vperm.xlu0 %3233, %v3730_v55  }
 0x72d   :  { %3063 = vmatprep.subr.mxu0 %v1018_v61 }
 0x72e   :  { %3064 = vmatpush3.msra.mxu0 %v1018_v61 }
 0x72f   :  { %3065 = vmatprep.subr.mxu0 %v1017_v62  ;;  %v1027_v7 = vpop.permute.xlu1 %1026  ;;  %1447 = vperm.xlu1 %3232, %v3736_v56  }
 0x730   :  { %3066 = vmatpush3.msra.mxu0 %v1017_v62  ;;  %1442 = vperm.xlu0 %3233, %v3742_v57  }
 0x731   :  { %3068 = vmatmul.mubr.msk.f32.vlgmr.msra.gmra.mxu0 %vm134_vm0, %v47_v63 }
 0x732   :  { %3070 = vmatprep.mubr.msk.f32.mxu0 %vm134_vm0, %v48_v3 }
 0x733   :  { %1452 = vperm.xlu1 %3232, %v3748_v43  }
 0x735   :  { %3071 = vmatmul.mubr.msk.f32.gmra.mxu0 %vm134_vm0, %v49_v8 }
 0x736   :  { %3073 = vmatprep.mubr.msk.f32.mxu0 %vm134_vm0, %v50_v4 }
 0x737   :  { %1462 = vperm.xlu1 %3232, %v3755_v36  }
 0x739   :  { %3074 = vmatmul.mubr.msk.f32.gmra.mxu0 %vm134_vm0, %v51_v16 }
 0x73a   :  { %3076 = vmatprep.mubr.msk.f32.mxu0 %vm134_vm0, %v52_v5 }
 0x73d   :  { %3077 = vmatmul.mubr.msk.f32.gmra.mxu0 %vm134_vm0, %v53_v18 }
 0x73e   :  { %3109 = vmatprep.mubr.msk.f32.mxu0 %vm134_vm0, %v2797_v51 }
 0x773   :  { %v1192_v58 = vpop.permute.xlu1 %1191  ;;  %v1196_v28 = vpop.permute.xlu0 %1195 }
 0x777   :  { %v1200_v59 = vpop.permute.xlu1 %1199 }
 0x77b   :  { %v1204_v8 = vpop.permute.xlu1 %1203 }
 0x7f1   :  { %v3069_v27 = vpop.f32.mrf.mxu0 }
 0x7f2   :  { %v1149_v17 = vadd.f32 %v3069_v27, %v1027_v7 }
 0x7f3   :  { %v1143_v30 = vpop.f32.mrf.mxu0 }
 0x7f4   :  { %v1144_v46 = vadd.f32 %v1143_v30, %v1023_v13  ;;  %v1183_v45 = vmax.f32 %v1149_v17, 0.0 }
 0x7f5   :  { %v3072_v0 = vpop.f32.mrf.mxu0 }
 0x7f6   :  { %v1159_v42 = vadd.f32 %v3072_v0, %v1035_v37  ;;  %v1182_v47 = vmax.f32 %v1144_v46, 0.0 }
 0x7f7   :  { %v1153_v31 = vpop.f32.mrf.mxu0 }
 0x7f8   :  { %v1154_v9 = vadd.f32 %v1153_v31, %v1031_v10  ;;  %v1185_v15 = vmax.f32 %v1159_v42, 0.0 }
 0x7f9   :  { %v3075_v33 = vpop.f32.mrf.mxu0 }
 0x7fa   :  { %v1169_v38 = vadd.f32 %v3075_v33, %v1043_v34  ;;  %v1184_v19 = vmax.f32 %v1154_v9, 0.0 }
 0x7fb   :  { %v1163_v14 = vpop.f32.mrf.mxu0 }
 0x7fc   :  { %v1164_v44 = vadd.f32 %v1163_v14, %v1039_v1  ;;  %v1187_v6 = vmax.f32 %v1169_v38, 0.0 }
 0x7fd   :  { %v3078_v35 = vpop.f32.mrf.mxu0 }
 0x7fe   :  { %v1179_v25 = vadd.f32 %v3078_v35, %v1051_v24  ;;  %v1186_v11 = vmax.f32 %v1164_v44, 0.0 }
 0x7ff   :  { %v1173_v26 = vpop.f32.mrf.mxu0 }
 0x800   :  { %v1189_v39 = vmax.f32 %v1179_v25, 0.0  ;;  %v1174_v41 = vadd.f32 %v1173_v26, %v1047_v29 }
 0x802   :  { %v1188_v2 = vmax.f32 %v1174_v41, 0.0  ;;  %3079 = vmatprep.subr.mxu1 %v1189_v39 }
 0x803   :  { %3080 = vmatpush3.msra.mxu1 %v1189_v39 }
 0x804   :  { %3081 = vmatprep.subr.mxu1 %v1188_v2 }
 0x805   :  { %3082 = vmatpush3.msra.mxu1 %v1188_v2 }
 0x806   :  { %3083 = vmatprep.subr.mxu1 %v1187_v6 }
 0x807   :  { %3084 = vmatpush3.msra.mxu1 %v1187_v6 }
 0x808   :  { %3085 = vmatprep.subr.mxu1 %v1186_v11 }
 0x809   :  { %3086 = vmatpush3.msra.mxu1 %v1186_v11 }
 0x80a   :  { %3087 = vmatprep.subr.mxu1 %v1185_v15 }
 0x80b   :  { %3088 = vmatpush3.msra.mxu1 %v1185_v15 }
 0x80c   :  { %3089 = vmatprep.subr.mxu1 %v1184_v19 }
 0x80d   :  { %3090 = vmatpush3.msra.mxu1 %v1184_v19 }
 0x80e   :  { %3091 = vmatprep.subr.mxu1 %v1183_v45 }
 0x80f   :  { %3092 = vmatpush3.msra.mxu1 %v1183_v45 }
 0x810   :  { %3093 = vmatprep.subr.mxu1 %v1182_v47 }
 0x811   :  { %3094 = vmatpush3.msra.mxu1 %v1182_v47 }
 0x812   :  { %3096 = vmatmul.mubr.msk.f32.vlgmr.msra.gmra.mxu1 %vm1206_vm6, %v55_v48  ;;  %3127 = vmatprep.subr.mxu1 %v3274_v32 }
 0x813   :  { %3098 = vmatprep.mubr.msk.f32.mxu1 %vm1206_vm6, %v56_v49 }
 0x816   :  { %3099 = vmatmul.mubr.msk.f32.gmra.mxu1 %vm1206_vm6, %v57_v50 }
 0x817   :  { %3129 = vmatprep.mubr.msk.f32.mxu1 %vm3275_vm1, %v3274_v32 }
 0x8d2   :  { %v3097_v60 = vpop.f32.mrf.mxu1 }
 0x8d3   :  { %v1291_v61 = vadd.f32 %v3097_v60, %v1196_v28  ;;  %v1360_v60 = vpop.permute.xlu1 %1359 }
 0x8d4   :  { %v1285_v62 = vpop.f32.mrf.mxu1 }
 0x8d5   :  { %v1286_v63 = vadd.f32 %v1285_v62, %v1192_v58  ;;  %v1305_v16 = vadd.f32 %v1291_v61, %v1291_v61  ;;  %v1364_v61 = vpop.permute.xlu0 %1363 }
 0x8d6   :  { %v3100_v3 = vpop.f32.mrf.mxu1 }
 0x8d7   :  { %v1304_v4 = vadd.f32 %v1286_v63, %v1286_v63  ;;  %v1301_v5 = vadd.f32 %v3100_v3, %v1204_v8  ;;  %v1309_v27 = vsel %vm310_vm2, %v1305_v16, 0.0  ;;  %v1384_v62 = vpop.permute.xlu1 %1383 }
 0x8d8   :  { %v1295_v18 = vpop.f32.mrf.mxu1 }
 0x8d9   :  { %v1308_v20 = vsel %vm310_vm2, %v1304_v4, 0.0  ;;  %v1296_v24 = vadd.f32 %v1295_v18, %v1200_v59  ;;  %v1307_v30 = vadd.f32 %v1301_v5, %v1301_v5  ;;  %v1356_v63 = vpop.permute.xlu0 %1355 }
 0x8da   :  { %v1310_v0 = vadd.f32 %v1309_v27, %v1308_v20 }
 0x8db   :  { %v1306_v29 = vadd.f32 %v1296_v24, %v1296_v24  ;;  %v1313_v33 = vsel %vm310_vm2, %v1307_v30, 0.0  ;;  %v1380_v5 = vpop.permute.xlu1 %1379 }
 0x8dd   :  { %v1311_v31 = vsel %vm310_vm2, %v1306_v29, 0.0  ;;  %v1352_v27 = vpop.permute.xlu0 %1351 }
 0x8de   :  { %v1312_v1 = vadd.f32 %v1311_v31, %v1310_v0 }
 0x8e0   :  { %v1314_v34 = vadd.f32 %v1313_v33, %v1312_v1  ;;  %v1376_v33 = vpop.permute.xlu1 %1375 }
 0x8e1   :  { %v1372_v1 = vpop.permute.xlu0 %1371 }
 0x8e2   :  { %v1315_v14 = vrot.slane %v1314_v34, 4 }
 0x8e4   :  { %v1316_v35 = vadd.f32 %v1315_v14, %v1314_v34 }
 0x8e6   :  { %v1317_v25 = vrot.slane %v1316_v35, 2 }
 0x8e8   :  { %v1318_v37 = vadd.f32 %v1317_v25, %v1316_v35  ;;  %v2798_v35 = vld [vmem:[%s4068_s1 + $0x68] sm:$0xff]  ;;  %v2799_v25 = vld [vmem:[%s4068_s1 + $0x70] sm:$0xff] }
 0x8ea   :  { %v1319_v26 = vrot.slane %v1318_v37, 1 }
 0x8ec   :  { %v1320_v38 = vadd.f32 %v1319_v26, %v1318_v37  ;;  %v2800_v37 = vld [vmem:[%s4068_s1 + $0x78] sm:$0xff]  ;;  %v2801_v26 = vld [vmem:[%s4068_s1 + $0x80] sm:$0xff] }
 0x8ee   :  { %v1321_v39 = vmul.f32 0.03125, %v1320_v38  ;;  %v2802_v38 = vld [vmem:[%s4068_s1 + $0x88] sm:$0xff] }
 0x8f0   :  { %v1322_v41 = vsub.f32 %v1304_v4, %v1321_v39  ;;  %v1323_v10 = vsub.f32 %v1305_v16, %v1321_v39  ;;  %v1324_v44 = vsub.f32 %v1306_v29, %v1321_v39  ;;  %v1325_v2 = vsub.f32 %v1307_v30, %v1321_v39  ;;  %v2803_v39 = vld [vmem:[%s4068_s1 + $0x90] sm:$0xff] }
 0x8f2   :  { %v1326_v42 = vmul.f32 %v1322_v41, %v1322_v41  ;;  %v1327_v6 = vmul.f32 %v1323_v10, %v1323_v10  ;;  %v1328_v7 = vmul.f32 %v1324_v44, %v1324_v44  ;;  %v1329_v9 = vmul.f32 %v1325_v2, %v1325_v2 }
 0x8f4   :  { %v1330_v11 = vsel %vm310_vm2, %v1326_v42, 0.0  ;;  %v1331_v13 = vsel %vm310_vm2, %v1327_v6, 0.0  ;;  %v1333_v17 = vsel %vm310_vm2, %v1328_v7, 0.0  ;;  %v1335_v46 = vsel %vm310_vm2, %v1329_v9, 0.0  ;;  %v2808_v42 = vld [vmem:[%s4068_s1 + $0xb8] sm:$0xff]  ;;  %v1468_v6 = vpop.permute.xlu1 %1467 }
 0x8f5   :  { %v1332_v15 = vadd.f32 %v1331_v13, %v1330_v11 }
 0x8f7   :  { %v1334_v19 = vadd.f32 %v1333_v17, %v1332_v15 }
 0x8f8   :  { %v1473_v7 = vpop.permute.xlu1 %1472 }
 0x8f9   :  { %v1336_v45 = vadd.f32 %v1335_v46, %v1334_v19 }
 0x8fb   :  { %v1337_v47 = vrot.slane %v1336_v45, 4 }
 0x8fc   :  { %v1448_v9 = vpop.permute.xlu1 %1447 }
 0x8fd   :  { %v1338_v48 = vadd.f32 %v1337_v47, %v1336_v45 }
 0x8ff   :  { %v1339_v49 = vrot.slane %v1338_v48, 2 }
 0x901   :  { %v1340_v50 = vadd.f32 %v1339_v49, %v1338_v48  ;;  %v1478_v48 = vpop.permute.xlu0 %1477 }
 0x903   :  { %v1341_v51 = vrot.slane %v1340_v50, 1 }
 0x905   :  { %v1342_v58 = vadd.f32 %v1341_v51, %v1340_v50 }
 0x907   :  { %v1343_v28 = vmul.f32 0.03125, %v1342_v58 }
 0x909   :  { %v1344_v59 = vadd.f32 1e-05, %v1343_v28  ;;  %v1453_v28 = vpop.permute.xlu1 %1452 }
 0x90b   :  { %3258 = vrsqrt.f32 %v1344_v59 }
 0x918   :  { %v3259_v3 = vpop.eup %3258 }
 0x919   :  { %v1349_v8 = vmul.f32 %v3259_v3, %v1325_v2  ;;  %v1348_v4 = vmul.f32 %v3259_v3, %v1324_v44  ;;  %v1347_v16 = vmul.f32 %v3259_v3, %v1323_v10  ;;  %v1346_v24 = vmul.f32 %v3259_v3, %v1322_v41  ;;  %v2804_v41 = vld [vmem:[%s4068_s1 + $0x98] sm:$0xff]  ;;  %v2805_v10 = vld [vmem:[%s4068_s1 + $0xa0] sm:$0xff]  ;;  %v2806_v44 = vld [vmem:[%s4068_s1 + $0xa8] sm:$0xff] }
 0x91a   :  { %v2807_v2 = vld [vmem:[%s4068_s1 + $0xb0] sm:$0xff]  ;;  %v2840_v3 = vld [vmem:[%s4069_s6 + $0xb8] sm:$0xff] }
 0x91b   :  { %v1369_v18 = vmul.f32 %v1364_v61, %v1349_v8  ;;  %v1368_v20 = vmul.f32 %v1360_v60, %v1348_v4  ;;  %v1367_v29 = vmul.f32 %v1356_v63, %v1347_v16  ;;  %v1366_v0 = vmul.f32 %v1352_v27, %v1346_v24  ;;  %v1458_v60 = vpop.permute.xlu0 %1457  ;;  %v2839_v63 = vld [vmem:[%s4069_s6 + $0xb0] sm:$0xff]  ;;  %v1463_v8 = vpop.permute.xlu1 %1462 }
 0x91d   :  { %v3766_v30 = vadd.f32 %v1384_v62, %v1369_v18  ;;  %v3768_v31 = vadd.f32 %v1380_v5, %v1368_v20  ;;  %v3772_v34 = vadd.f32 %v1376_v33, %v1367_v29  ;;  %v3776_v14 = vadd.f32 %v1372_v1, %v1366_v0  ;;  %v2838_v62 = vld [vmem:[%s4069_s6 + $0xa8] sm:$0xff] }
 0x91f   :  { %3101 = vmatprep.subr.mxu0 %v3766_v30  ;;  %v1443_v4 = vpop.permute.xlu0 %1442 }
 0x920   :  { %3102 = vmatpush3.msra.mxu0 %v3766_v30 }
 0x921   :  { %3103 = vmatprep.subr.mxu0 %v3768_v31 }
 0x922   :  { %3104 = vmatpush3.msra.mxu0 %v3768_v31 }
 0x923   :  { %3105 = vmatprep.subr.mxu0 %v3772_v34 }
 0x924   :  { %3106 = vmatpush3.msra.mxu0 %v3772_v34 }
 0x925   :  { %3107 = vmatprep.subr.mxu0 %v3776_v14 }
 0x926   :  { %3108 = vmatpush3.msra.mxu0 %v3776_v14 }
 0x927   :  { %3110 = vmatmul.mubr.msk.f32.vlgmr.msra.gmra.mxu0 %vm134_vm0, %v2798_v35 }
 0x928   :  { %3112 = vmatprep.mubr.msk.f32.mxu0 %vm134_vm0, %v2799_v25 }
 0x92b   :  { %3113 = vmatmul.mubr.msk.f32.gmra.mxu0 %vm134_vm0, %v2800_v37 }
 0x92c   :  { %3115 = vmatprep.mubr.msk.f32.mxu0 %vm134_vm0, %v2801_v26 }
 0x92f   :  { %3116 = vmatmul.mubr.msk.f32.gmra.mxu0 %vm134_vm0, %v2802_v38 }
 0x930   :  { %3118 = vmatprep.mubr.msk.f32.mxu0 %vm134_vm0, %v2803_v39 }
 0x933   :  { %3119 = vmatmul.mubr.msk.f32.gmra.mxu0 %vm134_vm0, %v2804_v41 }
 0x934   :  { %3121 = vmatprep.mubr.msk.f32.mxu0 %vm134_vm0, %v2805_v10 }
 0x937   :  { %3122 = vmatmul.mubr.msk.f32.gmra.mxu0 %vm134_vm0, %v2806_v44 }
 0x938   :  { %3124 = vmatprep.mubr.msk.f32.mxu0 %vm134_vm0, %v2807_v2 }
 0x93b   :  { %3125 = vmatmul.mubr.msk.f32.gmra.mxu0 %vm134_vm0, %v2808_v42 }
 0x9e7   :  { %v3111_v11 = vpop.f32.mrf.mxu0 }
 0x9e8   :  { %v3826_v13 = vadd.f32 %v3111_v11, %v1448_v9  ;;  %v2837_v11 = vld [vmem:[%s4069_s6 + $0xa0] sm:$0xff] }
 0x9e9   :  { %v1602_v15 = vpop.f32.mrf.mxu0 }
 0x9ea   :  { %1662 = vrot.lane.b32.xlu0 %v3826_v13, %s3273_s24  ;;  %v1603_v24 = vadd.f32 %v1602_v15, %v1443_v4 }
 0x9eb   :  { %v3114_v17 = vpop.f32.mrf.mxu0 }
 0x9ec   :  { %v1618_v61 = vadd.f32 %v3114_v17, %v1458_v60 }
 0x9ed   :  { %v1612_v19 = vpop.f32.mrf.mxu0 }
 0x9ee   :  { %v3835_v59 = vadd.f32 %v1612_v19, %v1453_v28 }
 0x9ef   :  { %v3117_v46 = vpop.f32.mrf.mxu0 }
 0x9f0   :  { %v3830_v45 = vadd.f32 %v3117_v46, %v1468_v6 }
 0x9f1   :  { %v1622_v47 = vpop.f32.mrf.mxu0 }
 0x9f2   :  { %1677 = vrot.lane.b32.xlu1 %v3830_v45, %s3273_s24  ;;  %v1623_v18 = vadd.f32 %v1622_v47, %v1463_v8 }
 0x9f3   :  { %v3120_v49 = vpop.f32.mrf.mxu0 }
 0x9f4   :  { %v1638_v50 = vadd.f32 %v3120_v49, %v1478_v48 }
 0x9f5   :  { %v1632_v51 = vpop.f32.mrf.mxu0 }
 0x9f6   :  { %v1633_v58 = vadd.f32 %v1632_v51, %v1473_v7  ;;  %1685 = vrot.lane.b32.xlu1 %v1638_v50, %s3276_s25 }
 0x9f7   :  { %v3123_v38 = vpop.f32.mrf.mxu0 }
 0x9f8   :  { %1681 = vrot.lane.b32.xlu0 %v1633_v58, %s3277_s26 }
 0x9f9   :  { %v1642_v6 = vpop.f32.mrf.mxu0 }
 0x9fa   :  { %1666 = vrot.lane.b32.xlu1 %v3835_v59, %s3277_s26 }
 0x9fb   :  { %v3126_v7 = vpop.f32.mrf.mxu0 }
 0x9fc   :  { %1670 = vrot.lane.b32.xlu0 %v1618_v61, %s3276_s25 }
 0x9fd   :  { %v1652_v15 = vpop.f32.mrf.mxu0 }
 0xa00   :  { %1487 = vperm.xlu0 %3233, %v2838_v62  }
 0xa04   :  { %1492 = vperm.xlu0 %3233, %v2839_v63  }
 0xa08   :  { %1497 = vperm.xlu0 %3233, %v2840_v3  }
 0xa5c   :  { %v1663_v5 = vpop.permute.xlu0 %1662 }
 0xa5d   :  { %v1673_v1 = vsel %vm308_vm3, %v1603_v24, %v1663_v5 }
 0xa64   :  { %v1678_v16 = vpop.permute.xlu1 %1677 }
 0xa65   :  { %v1688_v27 = vsel %vm308_vm3, %v1623_v18, %v1678_v16 }
 0xa68   :  { %v1686_v20 = vpop.permute.xlu1 %1685 }
 0xa6a   :  { %v1682_v29 = vpop.permute.xlu0 %1681 }
 0xa6b   :  { %v1689_v0 = vsel %vm310_vm2, %v1688_v27, %v1682_v29 }
 0xa6c   :  { %v1690_v33 = vsel %vm312_vm4, %v1689_v0, %v1686_v20  ;;  %v1667_v35 = vpop.permute.xlu1 %1666 }
 0xa6d   :  { %v1674_v25 = vsel %vm310_vm2, %v1673_v1, %v1667_v35  ;;  %3128 = vmatpush3.xpose.msk.msra.mxu1 %vm329_vm5, %v1690_v33 }
 0xa6e   :  { %v1671_v37 = vpop.permute.xlu0 %1670  ;;  %3132 = vmatprep.subr.mxu1 %v3274_v32 }
 0xa6f   :  { %v1675_v26 = vsel %vm312_vm4, %v1674_v25, %v1671_v37 }
 0xa70   :  { %3130 = vmatmul.mubr.msk.f32.vlgmr.msra.gmra.mxu1 %vm329_vm5, %v1675_v26 }
 0xa71   :  { %3134 = vmatprep.mubr.msk.f32.mxu1 %vm3275_vm1, %v3274_v32 }
 0xa7b   :  { %v1488_v39 = vpop.permute.xlu0 %1487 }
 0xa7c   :  { %v3861_v41 = vadd.f32 %v3123_v38, %v1488_v39 }
 0xa7e   :  { %1780 = vrot.lane.b32.xlu0 %v3861_v41, %s3273_s24 }
 0xa7f   :  { %v1493_v9 = vpop.permute.xlu0 %1492 }
 0xa80   :  { %v3870_v17 = vadd.f32 %v1652_v15, %v1493_v9  ;;  %v2827_v9 = vld [vmem:[%s4071_s5 + $0x30] sm:$0xff] }
 0xa82   :  { %1887 = vrot.lane.b32.xlu0 %v1638_v50, %s3277_s26 }
 0xa83   :  { %v1498_v19 = vpop.permute.xlu0 %1497 }
 0xa84   :  { %v1658_v46 = vadd.f32 %v3126_v7, %v1498_v19  ;;  %v2811_v7 = vld [vmem:[%s4070_s2 + $0x30] sm:$0xff] }
 0xaf0   :  { %v1781_v28 = vpop.permute.xlu0 %1780 }
 0xaf4   :  { %v1888_v4 = vpop.permute.xlu0 %1887 }
 0xb30   :  { %v1763_v10 = vpop.f32.mrf.mxu1 }
 0xb31   :  { %v1767_v44 = vmul.f32 0.25, %v1763_v10 }
 0xb32   :  { %v3131_v2 = vpop.f32.mrf.mxu1 }
 0xb33   :  { %v1768_v42 = vsel %vm310_vm2, %v1767_v44, -inf  ;;  %v3918_v2 = vld [vmem:[%s4071_s5 + $0x28] sm:$0xff] }
 0xb34   :  { %1769 = vmax.xlane.f32.xlu1 %v1768_v42  ;;  %v2828_v42 = vld [vmem:[%s4071_s5 + $0x38] sm:$0xff] }
 0xb45   :  { %1482 = vperm.xlu1 %3232, %v2837_v11   ;;  %v2825_v11 = vld [vmem:[%s4071_s5 + $0x20] sm:$0xff] }
 0xb49   :  { %1784 = vrot.lane.b32.xlu1 %v3870_v17, %s3277_s26 }
 0xb4d   :  { %1788 = vrot.lane.b32.xlu1 %v1658_v46, %s3276_s25 }
 0xb51   :  { %1881 = vrot.lane.b32.xlu1 %v1623_v18, %s3278_s12 }
 0xb55   :  { %1884 = vrot.lane.b32.xlu1 %v1633_v58, %s3273_s24 }
 0xb59   :  { %1868 = vrot.lane.b32.xlu1 %v1603_v24, %s3278_s12 }
 0xb5d   :  { %1874 = vrot.lane.b32.xlu1 %v1618_v61, %s3277_s26 }
 0xbbd   :  { %v1770_v47 = vpop.xlane.xlu1 %1769 }
 0xbbe   :  { %v1771_v48 = vsub.f32 %v1767_v44, %v1770_v47  ;;  %v2812_v44 = vld [vmem:[%s4070_s2 + $0x38] sm:$0xff] }
 0xbc0   :  { %v1772_v49 = vmul.f32 1.442695, %v1771_v48 }
 0xbc1   :  { %v1483_v50 = vpop.permute.xlu1 %1482 }
 0xbc2   :  { %3260 = vpow2.f32 %v1772_v49  ;;  %v1643_v51 = vadd.f32 %v1642_v6, %v1483_v50  ;;  %v2809_v6 = vld [vmem:[%s4070_s2 + $0x20] sm:$0xff] }
 0xbc3   :  { %3157 = vmatprep.mubr.msk.f32.mxu0 %vm329_vm5, %v2809_v6  ;;  %v2813_v49 = vld [vmem:[%s4072_s3 + $0x40] sm:$0xff] }
 0xbc4   :  { %v1791_v62 = vsel %vm308_vm3, %v1643_v51, %v1781_v28 }
 0xbc5   :  { %v1785_v60 = vpop.permute.xlu1 %1784 }
 0xbc6   :  { %v1792_v63 = vsel %vm310_vm2, %v1791_v62, %v1785_v60 }
 0xbc9   :  { %v1789_v3 = vpop.permute.xlu1 %1788 }
 0xbca   :  { %v1793_v8 = vsel %vm312_vm4, %v1792_v63, %v1789_v3 }
 0xbcb   :  { %3133 = vmatpush3.msra.mxu1 %v1793_v8 }
 0xbcc   :  { %3137 = vmatprep.subr.mxu1 %v3274_v32 }
 0xbcd   :  { %v1882_v5 = vpop.permute.xlu1 %1881 }
 0xbce   :  { %v1890_v20 = vsel %vm308_vm3, %v1882_v5, %v3830_v45 }
 0xbcf   :  { %v3261_v58 = vpop.eup %3260 }
 0xbd0   :  { %v1774_v61 = vsel %vm310_vm2, %v3261_v58, 0.0 }
 0xbd1   :  { %1775 = vadd.xlane.f32.xlu0 %v1774_v61  ;;  %v1885_v18 = vpop.permute.xlu1 %1884 }
 0xbd2   :  { %v1891_v29 = vsel %vm310_vm2, %v1890_v20, %v1885_v18 }
 0xbd3   :  { %v1892_v35 = vsel %vm312_vm4, %v1891_v29, %v1888_v4 }
 0xbd5   :  { %v1869_v24 = vpop.permute.xlu1 %1868 }
 0xbd6   :  { %v1877_v33 = vsel %vm308_vm3, %v1869_v24, %v3826_v13 }
 0xbd9   :  { %v1875_v45 = vpop.permute.xlu1 %1874 }
 0xbe7   :  { %1871 = vrot.lane.b32.xlu0 %v3835_v59, %s3273_s24 }
 0xc5a   :  { %v1776_v16 = vpop.xlane.xlu0 %1775 }
 0xc5b   :  { %3262 = vrcp.f32 %v1776_v16 }
 0xc5e   :  { %v1872_v0 = vpop.permute.xlu0 %1871 }
 0xc5f   :  { %v1878_v59 = vsel %vm310_vm2, %v1877_v33, %v1872_v0 }
 0xc60   :  { %v1879_v25 = vsel %vm312_vm4, %v1878_v59, %v1875_v45 }
 0xc68   :  { %v3263_v27 = vpop.eup %3262 }
 0xc69   :  { %v1778_v1 = vmul.f32 %v3263_v27, %v3261_v58 }
 0xc6b   :  { %3135 = vmatmul.mubr.msk.f32.vlgmr.msra.gmra.mxu1 %vm310_vm2, %v1778_v1 }
 0xc6c   :  { %3138 = vmatpush3.xpose.msk.msra.mxu1 %vm329_vm5, %v1892_v35  ;;  %3139 = vmatprep.mubr.msk.f32.mxu1 %vm3275_vm1, %v3274_v32 }
 0xc6d   :  { %3142 = vmatprep.subr.mxu1 %v3274_v32 }
 0xc6f   :  { %3140 = vmatmul.mubr.msk.f32.vlgmr.msra.gmra.mxu1 %vm329_vm5, %v1879_v25 }
 0xc70   :  { %3144 = vmatprep.mubr.msk.f32.mxu1 %vm3275_vm1, %v3274_v32  ;;  %v2810_v32 = vld [vmem:[%s4070_s2 + $0x28] sm:$0xff] }
 0xd2b   :  { %v1863_v13 = vpop.f32.mrf.mxu1 }
 0xd2c   :  { %3155 = vmatprep.subr.msk.mxu0 %vm329_vm5, %v1863_v13 }
 0xd2d   :  { %v3136_v37 = vpop.f32.mrf.mxu1  ;;  %3156 = vmatpush3.xpose.msk.msra.mxu0 %vm329_vm5, %v1863_v13 }
 0xd2f   :  { %v1965_v26 = vpop.f32.mrf.mxu1 }
 0xd30   :  { %v1969_v38 = vmul.f32 0.25, %v1965_v26  ;;  %3158 = vmatmul.mubr.msk.f32.vlgmr.msra.gmra.mxu0 %vm329_vm5, %v2810_v32 }
 0xd31   :  { %v3141_v39 = vpop.f32.mrf.mxu1  ;;  %3160 = vmatprep.mubr.msk.f32.mxu0 %vm329_vm5, %v2811_v7 }
 0xd32   :  { %v1970_v10 = vsel %vm310_vm2, %v1969_v38, -inf }
 0xd33   :  { %1971 = vmax.xlane.f32.xlu0 %v1970_v10 }
 0xd34   :  { %3161 = vmatmul.mubr.msk.f32.gmra.mxu0 %vm329_vm5, %v2812_v44 }
 0xd49   :  { %1982 = vrot.lane.b32.xlu0 %v1643_v51, %s3278_s12 }
 0xd4d   :  { %1988 = vrot.lane.b32.xlu0 %v1658_v46, %s3277_s26 }
 0xd51   :  { %2073 = vrot.lane.b32.xlu0 %v2810_v32, %s3279_s15 }
 0xd55   :  { %2077 = vrot.lane.b32.xlu0 %v2812_v44, %s3279_s15 }
 0xd59   :  { %2278 = vperm.xlu0 %3233, %v3918_v2  }
 0xd5d   :  { %2288 = vperm.xlu0 %3233, %v2828_v42  }
 0xd61   :  { %3235 = vset.pattern.permute.xlu0 %v3280_v40 }
 0xd62   :  { %2350 = vperm.xlu0 %3235, %v2827_v9  }
 0xd66   :  { %3238 = vset.pattern.permute.xlu0 %v3281_v12 }
 0xd67   :  { %2370 = vperm.xlu0 %3238, %v2827_v9  }
 0xd6b   :  { %2362 = vperm.xlu0 %3238, %v2825_v11  }
 0xd6f   :  { %3241 = vset.pattern.permute.xlu0 %v3280_v40 }
 0xd70   :  { %2406 = vperm.xlu0 %3241, %v3724_v54  }
 0xd74   :  { %2394 = vperm.xlu0 %3241, %v3730_v55  }
 0xd78   :  { %2386 = vperm.xlu0 %3241, %v3736_v56  }
 0xd7c   :  { %3242 = vset.pattern.permute.xlu0 %v3282_v21 }
 0xd7d   :  { %2551 = vperm.xlu0 %3242, %v2825_v11  }
 0xd81   :  { %2563 = vperm.xlu0 %3242, %v2828_v42  }
 0xd85   :  { %3245 = vset.pattern.permute.xlu0 %v3283_v22 }
 0xd86   :  { %2714 = vperm.xlu0 %3245, %v3918_v2  }
 0xd8a   :  { %3246 = vset.pattern.permute.xlu0 %v3284_v23 }
 0xd8b   :  { %2730 = vperm.xlu0 %3246, %v2825_v11  }
 0xd8f   :  { %2742 = vperm.xlu0 %3246, %v2828_v42  }
 0xdbc   :  { %v1972_v15 = vpop.xlane.xlu0 %1971 }
 0xdbd   :  { %v1973_v19 = vsub.f32 %v1969_v38, %v1972_v15 }
 0xdbf   :  { %v1974_v46 = vmul.f32 1.442695, %v1973_v19 }
 0xdc1   :  { %3264 = vpow2.f32 %v1974_v46 }
 0xdce   :  { %v3265_v54 = vpop.eup %3264 }
 0xdcf   :  { %v1976_v55 = vsel %vm310_vm2, %v3265_v54, 0.0 }
 0xdd0   :  { %1977 = vadd.xlane.f32.xlu1 %v1976_v55 }
 0xde1   :  { %1985 = vrot.lane.b32.xlu1 %v3870_v17, %s3273_s24 }
 0xde5   :  { %2071 = vrot.lane.b32.xlu1 %v2809_v6, %s3279_s15 }
 0xde9   :  { %2075 = vrot.lane.b32.xlu1 %v2811_v7, %s3279_s15 }
 0xded   :  { %2273 = vperm.xlu1 %3232, %v2825_v11  }
 0xdf0   :  { %v3159_v50 = vpop.f32.mrf.mxu0 }
 0xdf1   :  { %2283 = vperm.xlu1 %3232, %v2827_v9  }
 0xdf2   :  { %v2252_v51 = vpop.f32.mrf.mxu0 }
 0xdf4   :  { %v3162_v8 = vpop.f32.mrf.mxu0 }
 0xdf5   :  { %3234 = vset.pattern.permute.xlu1 %v3280_v40 }
 0xdf6   :  { %2354 = vperm.xlu1 %3234, %v2828_v42   ;;  %v2262_v24 = vpop.f32.mrf.mxu0 }
 0xdfa   :  { %3236 = vset.pattern.permute.xlu1 %v3281_v12 }
 0xdfb   :  { %2374 = vperm.xlu1 %3236, %v2828_v42  }
 0xdff   :  { %3237 = vset.pattern.permute.xlu1 %v3280_v40 }
 0xe00   :  { %2346 = vperm.xlu1 %3237, %v3918_v2  }
 0xe04   :  { %2342 = vperm.xlu1 %3237, %v2825_v11  }
 0xe08   :  { %3239 = vset.pattern.permute.xlu1 %v3281_v12 }
 0xe09   :  { %2366 = vperm.xlu1 %3239, %v3918_v2  }
 0xe0d   :  { %3240 = vset.pattern.permute.xlu1 %v3280_v40  ;;  %v1983_v40 = vpop.permute.xlu0 %1982 }
 0xe0e   :  { %2410 = vperm.xlu1 %3240, %v3719_v53  }
 0xe11   :  { %v1989_v53 = vpop.permute.xlu0 %1988 }
 0xe12   :  { %2402 = vperm.xlu1 %3240, %v3713_v52   ;;  %v1991_v52 = vsel %vm308_vm3, %v1983_v40, %v3861_v41 }
 0xe15   :  { %v2074_v17 = vpop.permute.xlu0 %2073 }
 0xe16   :  { %2398 = vperm.xlu1 %3240, %v3755_v36  }
 0xe19   :  { %v2078_v48 = vpop.permute.xlu0 %2077 }
 0xe1a   :  { %2390 = vperm.xlu1 %3240, %v3748_v43  }
 0xe1d   :  { %v2279_v28 = vpop.permute.xlu0 %2278 }
 0xe1e   :  { %2382 = vperm.xlu1 %3240, %v3742_v57  }
 0xe21   :  { %v2289_v16 = vpop.permute.xlu0 %2288 }
 0xe22   :  { %3243 = vset.pattern.permute.xlu1 %v3282_v21 }
 0xe23   :  { %2555 = vperm.xlu1 %3243, %v3918_v2  }
 0xe27   :  { %2559 = vperm.xlu1 %3243, %v2827_v9  }
 0xe2b   :  { %3244 = vset.pattern.permute.xlu1 %v3283_v22 }
 0xe2c   :  { %2710 = vperm.xlu1 %3244, %v2825_v11  }
 0xe30   :  { %2718 = vperm.xlu1 %3244, %v2827_v9  }
 0xe34   :  { %2722 = vperm.xlu1 %3244, %v2828_v42  }
 0xe38   :  { %3247 = vset.pattern.permute.xlu1 %v3284_v23 }
 0xe39   :  { %2734 = vperm.xlu1 %3247, %v3918_v2  }
 0xe3d   :  { %2738 = vperm.xlu1 %3247, %v2827_v9  }
 0xe59   :  { %v1978_v12 = vpop.xlane.xlu1 %1977 }
 0xe5a   :  { %3266 = vrcp.f32 %v1978_v12 }
 0xe5d   :  { %v1986_v21 = vpop.permute.xlu1 %1985 }
 0xe5e   :  { %v1992_v56 = vsel %vm310_vm2, %v1991_v52, %v1986_v21 }
 0xe5f   :  { %v1993_v22 = vsel %vm312_vm4, %v1992_v56, %v1989_v53 }
 0xe60   :  { %3143 = vmatpush3.msra.mxu1 %v1993_v22 }
 0xe61   :  { %v2072_v36 = vpop.permute.xlu1 %2071 }
 0xe65   :  { %v2076_v41 = vpop.permute.xlu1 %2075 }
 0xe67   :  { %v3267_v57 = vpop.eup %3266 }
 0xe68   :  { %v1980_v43 = vmul.f32 %v3267_v57, %v3265_v54 }
 0xe69   :  { %v2274_v62 = vpop.permute.xlu1 %2273 }
 0xe6a   :  { %3145 = vmatmul.mubr.msk.f32.vlgmr.msra.gmra.mxu1 %vm310_vm2, %v1980_v43 }
 0xe6b   :  { %3149 = vmatprep.mubr.msk.f32.mxu1 %vm329_vm5, %v2072_v36 }
 0xe6d   :  { %v2284_v33 = vpop.permute.xlu1 %2283 }
 0xf2a   :  { %v2063_v23 = vpop.f32.mrf.mxu1 }
 0xf2b   :  { %3147 = vmatprep.subr.msk.mxu1 %vm329_vm5, %v2063_v23 }
 0xf2c   :  { %v3146_v47 = vpop.f32.mrf.mxu1  ;;  %3148 = vmatpush3.xpose.msk.msra.mxu1 %vm329_vm5, %v2063_v23 }
 0xf2f   :  { %3150 = vmatmul.mubr.msk.f32.vlgmr.msra.gmra.mxu1 %vm329_vm5, %v2074_v17  ;;  %v2355_v17 = vpop.permute.xlu1 %2354 }
 0xf30   :  { %3152 = vmatprep.mubr.msk.f32.mxu1 %vm329_vm5, %v2076_v41 }
 0xf33   :  { %3153 = vmatmul.mubr.msk.f32.gmra.mxu1 %vm329_vm5, %v2078_v48  ;;  %v2375_v48 = vpop.permute.xlu1 %2374 }
 0xf34   :  { %3171 = vmatprep.mubr.msk.f32.mxu1 %vm134_vm0, %v2813_v49 }
 0xf37   :  { %v2347_v49 = vpop.permute.xlu1 %2346 }
 0xfef   :  { %v3151_v60 = vpop.f32.mrf.mxu1 }
 0xff0   :  { %v2258_v63 = vadd.f32 %v3159_v50, %v3151_v60  ;;  %v2351_v50 = vpop.permute.xlu0 %2350 }
 0xff1   :  { %v2156_v3 = vpop.f32.mrf.mxu1 }
 0xff2   :  { %v2292_v58 = vadd.f32 %v2279_v28, %v2258_v63  ;;  %v2253_v61 = vadd.f32 %v2252_v51, %v2156_v3  ;;  %v2343_v28 = vpop.permute.xlu1 %2342 }
 0xff3   :  { %v3154_v4 = vpop.f32.mrf.mxu1 }
 0xff4   :  { %v2291_v5 = vadd.f32 %v2274_v62, %v2253_v61  ;;  %v2268_v18 = vadd.f32 %v3162_v8, %v3154_v4  ;;  %v2296_v27 = vadd.f32 %v2292_v58, %v3772_v34  ;;  %v2371_v3 = vpop.permute.xlu0 %2370 }
 0xff5   :  { %v2166_v20 = vpop.f32.mrf.mxu1 }
 0xff6   :  { %v2295_v29 = vadd.f32 %v2291_v5, %v3776_v14  ;;  %v2294_v0 = vadd.f32 %v2289_v16, %v2268_v18  ;;  %v2263_v1 = vadd.f32 %v2262_v24, %v2166_v20  ;;  %v2300_v45 = vsel %vm310_vm2, %v2296_v27, 0.0  ;;  %v2367_v5 = vpop.permute.xlu1 %2366 }
 0xff8   :  { %v2299_v35 = vsel %vm310_vm2, %v2295_v29, 0.0  ;;  %v2293_v59 = vadd.f32 %v2284_v33, %v2263_v1  ;;  %v2298_v25 = vadd.f32 %v2294_v0, %v3766_v30  ;;  %v2363_v24 = vpop.permute.xlu0 %2362  ;;  %v2814_v0 = vld [vmem:[%s4072_s3 + $0x48] sm:$0xff]  ;;  %v2815_v1 = vld [vmem:[%s4072_s3 + $0x50] sm:$0xff]  ;;  %v2816_v33 = vld [vmem:[%s4072_s3 + $0x58] sm:$0xff] }
 0xff9   :  { %v2301_v37 = vadd.f32 %v2300_v45, %v2299_v35  ;;  %v2817_v35 = vld [vmem:[%s4072_s3 + $0x60] sm:$0xff]  ;;  %v2819_v45 = vld [vmem:[%s4072_s3 + $0x70] sm:$0xff] }
 0xffa   :  { %v2297_v13 = vadd.f32 %v2293_v59, %v3768_v31  ;;  %v2304_v34 = vsel %vm310_vm2, %v2298_v25, 0.0  ;;  %v2818_v59 = vld [vmem:[%s4072_s3 + $0x68] sm:$0xff] }
 0xffc   :  { %v2302_v26 = vsel %vm310_vm2, %v2297_v13, 0.0 }
 0xffd   :  { %v2303_v38 = vadd.f32 %v2302_v26, %v2301_v37  ;;  %v2411_v37 = vpop.permute.xlu1 %2410 }
 0xfff   :  { %v2305_v39 = vadd.f32 %v2304_v34, %v2303_v38 }
0x1001   :  { %v2306_v14 = vrot.slane %v2305_v39, 4 }
0x1003   :  { %v2307_v10 = vadd.f32 %v2306_v14, %v2305_v39  ;;  %v2403_v39 = vpop.permute.xlu1 %2402 }
0x1005   :  { %v2308_v32 = vrot.slane %v2307_v10, 2 }
0x1007   :  { %v2309_v44 = vadd.f32 %v2308_v32, %v2307_v10  ;;  %v2407_v32 = vpop.permute.xlu0 %2406 }
0x1009   :  { %v2310_v2 = vrot.slane %v2309_v44, 1 }
0x100b   :  { %v2311_v42 = vadd.f32 %v2310_v2, %v2309_v44  ;;  %v2399_v44 = vpop.permute.xlu1 %2398 }
0x100d   :  { %v2312_v6 = vmul.f32 0.03125, %v2311_v42 }
0x100f   :  { %v2315_v7 = vsub.f32 %v2297_v13, %v2312_v6  ;;  %v2313_v9 = vsub.f32 %v2295_v29, %v2312_v6  ;;  %v2314_v11 = vsub.f32 %v2296_v27, %v2312_v6  ;;  %v2316_v30 = vsub.f32 %v2298_v25, %v2312_v6  ;;  %v2820_v25 = vld [vmem:[%s4072_s3 + $0x78] sm:$0xff]  ;;  %v2821_v13 = vld [vmem:[%s4073_s4 + $0x20] sm:$0xff] }
0x1010   :  { %3199 = vmatprep.mubr.msk.f32.mxu0 %vm1206_vm6, %v2821_v13 }
0x1011   :  { %v2319_v15 = vmul.f32 %v2315_v7, %v2315_v7  ;;  %v2317_v31 = vmul.f32 %v2313_v9, %v2313_v9  ;;  %v2318_v19 = vmul.f32 %v2314_v11, %v2314_v11  ;;  %v2320_v46 = vmul.f32 %v2316_v30, %v2316_v30 }
0x1013   :  { %v2321_v54 = vsel %vm310_vm2, %v2317_v31, 0.0  ;;  %v2322_v55 = vsel %vm310_vm2, %v2318_v19, 0.0  ;;  %v2324_v12 = vsel %vm310_vm2, %v2319_v15, 0.0  ;;  %v2326_v21 = vsel %vm310_vm2, %v2320_v46, 0.0  ;;  %v2391_v31 = vpop.permute.xlu1 %2390 }
0x1014   :  { %v2323_v40 = vadd.f32 %v2322_v55, %v2321_v54 }
0x1016   :  { %v2325_v52 = vadd.f32 %v2324_v12, %v2323_v40 }
0x1018   :  { %v2327_v53 = vadd.f32 %v2326_v21, %v2325_v52  ;;  %v2383_v21 = vpop.permute.xlu1 %2382 }
0x101a   :  { %v2328_v56 = vrot.slane %v2327_v53, 4 }
0x101c   :  { %v2329_v22 = vadd.f32 %v2328_v56, %v2327_v53 }
0x101e   :  { %v2330_v57 = vrot.slane %v2329_v22, 2 }
0x1020   :  { %v2331_v43 = vadd.f32 %v2330_v57, %v2329_v22 }
0x1022   :  { %v2332_v36 = vrot.slane %v2331_v43, 1 }
0x1024   :  { %v2333_v23 = vadd.f32 %v2332_v36, %v2331_v43 }
0x1026   :  { %v2334_v47 = vmul.f32 0.03125, %v2333_v23  ;;  %v2822_v23 = vld [vmem:[%s4073_s4 + $0x28] sm:$0xff] }
0x1028   :  { %v2335_v41 = vadd.f32 1e-05, %v2334_v47  ;;  %v2824_v47 = vld [vmem:[%s4073_s4 + $0x38] sm:$0xff] }
0x102a   :  { %3268 = vrsqrt.f32 %v2335_v41 }
0x1037   :  { %v3269_v51 = vpop.eup %3268 }
0x1038   :  { %v2340_v60 = vmul.f32 %v3269_v51, %v2316_v30  ;;  %v2338_v62 = vmul.f32 %v3269_v51, %v2314_v11  ;;  %v2339_v63 = vmul.f32 %v3269_v51, %v2315_v7  ;;  %v2337_v61 = vmul.f32 %v3269_v51, %v2313_v9  ;;  %v2395_v7 = vpop.permute.xlu0 %2394 }
0x103a   :  { %v2360_v8 = vmul.f32 %v2355_v17, %v2340_v60  ;;  %v2359_v58 = vmul.f32 %v2351_v50, %v2339_v63  ;;  %v2358_v16 = vmul.f32 %v2347_v49, %v2338_v62  ;;  %v2357_v18 = vmul.f32 %v2343_v28, %v2337_v61  ;;  %v2823_v17 = vld [vmem:[%s4073_s4 + $0x30] sm:$0xff]  ;;  %v2556_v49 = vpop.permute.xlu1 %2555 }
0x103c   :  { %v2380_v4 = vadd.f32 %v2375_v48, %v2360_v8  ;;  %v2379_v20 = vadd.f32 %v2371_v3, %v2359_v58  ;;  %v2378_v27 = vadd.f32 %v2367_v5, %v2358_v16  ;;  %v2377_v29 = vadd.f32 %v2363_v24, %v2357_v18  ;;  %v2387_v40 = vpop.permute.xlu0 %2386 }
0x103e   :  { %3163 = vmatprep.subr.mxu1 %v2380_v4  ;;  %v2560_v58 = vpop.permute.xlu1 %2559 }
0x103f   :  { %3164 = vmatpush3.msra.mxu1 %v2380_v4 }
0x1040   :  { %3165 = vmatprep.subr.mxu1 %v2379_v20  ;;  %v2552_v41 = vpop.permute.xlu0 %2551 }
0x1041   :  { %3166 = vmatpush3.msra.mxu1 %v2379_v20 }
0x1042   :  { %3167 = vmatprep.subr.mxu1 %v2378_v27 }
0x1043   :  { %3168 = vmatpush3.msra.mxu1 %v2378_v27 }
0x1044   :  { %3169 = vmatprep.subr.mxu1 %v2377_v29  ;;  %v2564_v28 = vpop.permute.xlu0 %2563 }
0x1045   :  { %3170 = vmatpush3.msra.mxu1 %v2377_v29 }
0x1046   :  { %3172 = vmatmul.mubr.msk.f32.vlgmr.msra.gmra.mxu1 %vm134_vm0, %v2814_v0 }
0x1047   :  { %3174 = vmatprep.mubr.msk.f32.mxu1 %vm134_vm0, %v2815_v1 }
0x104a   :  { %3175 = vmatmul.mubr.msk.f32.gmra.mxu1 %vm134_vm0, %v2816_v33 }
0x104b   :  { %3177 = vmatprep.mubr.msk.f32.mxu1 %vm134_vm0, %v2817_v35 }
0x104e   :  { %3178 = vmatmul.mubr.msk.f32.gmra.mxu1 %vm134_vm0, %v2818_v59 }
0x104f   :  { %3180 = vmatprep.mubr.msk.f32.mxu1 %vm134_vm0, %v2819_v45 }
0x1052   :  { %3181 = vmatmul.mubr.msk.f32.gmra.mxu1 %vm134_vm0, %v2820_v25 }
0x1106   :  { %v3173_v26 = vpop.f32.mrf.mxu1 }
0x1107   :  { %v2509_v56 = vadd.f32 %v3173_v26, %v2387_v40  ;;  %v2711_v40 = vpop.permute.xlu1 %2710 }
0x1108   :  { %v2503_v38 = vpop.f32.mrf.mxu1 }
0x1109   :  { %v2504_v57 = vadd.f32 %v2503_v38, %v2383_v21  ;;  %v2543_v43 = vmax.f32 %v2509_v56, 0.0 }
0x110a   :  { %v3176_v34 = vpop.f32.mrf.mxu1 }
0x110b   :  { %v2519_v55 = vadd.f32 %v3176_v34, %v2395_v7  ;;  %v2542_v36 = vmax.f32 %v2504_v57, 0.0  ;;  %v2719_v21 = vpop.permute.xlu1 %2718 }
0x110c   :  { %v2513_v14 = vpop.f32.mrf.mxu1 }
0x110d   :  { %v2514_v52 = vadd.f32 %v2513_v14, %v2391_v31  ;;  %v2545_v53 = vmax.f32 %v2519_v55, 0.0 }
0x110e   :  { %v3179_v10 = vpop.f32.mrf.mxu1 }
0x110f   :  { %v2529_v11 = vadd.f32 %v3179_v10, %v2403_v39  ;;  %v2544_v22 = vmax.f32 %v2514_v52, 0.0  ;;  %v2723_v56 = vpop.permute.xlu1 %2722 }
0x1110   :  { %v2523_v2 = vpop.f32.mrf.mxu1 }
0x1111   :  { %v2524_v19 = vadd.f32 %v2523_v2, %v2399_v44  ;;  %v2547_v54 = vmax.f32 %v2529_v11, 0.0 }
0x1112   :  { %v3182_v42 = vpop.f32.mrf.mxu1 }
0x1113   :  { %v2539_v6 = vadd.f32 %v3182_v42, %v2411_v37  ;;  %v2546_v12 = vmax.f32 %v2524_v19, 0.0 }
0x1114   :  { %v2533_v9 = vpop.f32.mrf.mxu1 }
0x1115   :  { %v2549_v30 = vmax.f32 %v2539_v6, 0.0  ;;  %v2534_v15 = vadd.f32 %v2533_v9, %v2407_v32 }
0x1117   :  { %v2548_v46 = vmax.f32 %v2534_v15, 0.0  ;;  %3183 = vmatprep.subr.mxu0 %v2549_v30 }
0x1118   :  { %3184 = vmatpush3.msra.mxu0 %v2549_v30 }
0x1119   :  { %3185 = vmatprep.subr.mxu0 %v2548_v46 }
0x111a   :  { %3186 = vmatpush3.msra.mxu0 %v2548_v46 }
0x111b   :  { %3187 = vmatprep.subr.mxu0 %v2547_v54 }
0x111c   :  { %3188 = vmatpush3.msra.mxu0 %v2547_v54 }
0x111d   :  { %3189 = vmatprep.subr.mxu0 %v2546_v12 }
0x111e   :  { %3190 = vmatpush3.msra.mxu0 %v2546_v12 }
0x111f   :  { %3191 = vmatprep.subr.mxu0 %v2545_v53 }
0x1120   :  { %3192 = vmatpush3.msra.mxu0 %v2545_v53  ;;  %v2715_v53 = vpop.permute.xlu0 %2714 }
0x1121   :  { %3193 = vmatprep.subr.mxu0 %v2544_v22 }
0x1122   :  { %3194 = vmatpush3.msra.mxu0 %v2544_v22  ;;  %v2735_v22 = vpop.permute.xlu1 %2734 }
0x1123   :  { %3195 = vmatprep.subr.mxu0 %v2543_v43 }
0x1124   :  { %3196 = vmatpush3.msra.mxu0 %v2543_v43  ;;  %v2731_v57 = vpop.permute.xlu0 %2730 }
0x1125   :  { %3197 = vmatprep.subr.mxu0 %v2542_v36 }
0x1126   :  { %3198 = vmatpush3.msra.mxu0 %v2542_v36 }
0x1127   :  { %3200 = vmatmul.mubr.msk.f32.vlgmr.msra.gmra.mxu0 %vm1206_vm6, %v2822_v23 }
0x1128   :  { %3202 = vmatprep.mubr.msk.f32.mxu0 %vm1206_vm6, %v2823_v17 }
0x112b   :  { %3203 = vmatmul.mubr.msk.f32.gmra.mxu0 %vm1206_vm6, %v2824_v47 }
0x11e7   :  { %v3201_v48 = vpop.f32.mrf.mxu0 }
0x11e8   :  { %v2650_v50 = vadd.f32 %v3201_v48, %v2556_v49 }
0x11e9   :  { %v2644_v51 = vpop.f32.mrf.mxu0 }
0x11ea   :  { %v2645_v60 = vadd.f32 %v2644_v51, %v2552_v41  ;;  %v2664_v63 = vadd.f32 %v2650_v50, %v2650_v50  ;;  %v2739_v51 = vpop.permute.xlu1 %2738 }
0x11eb   :  { %v3204_v62 = vpop.f32.mrf.mxu0 }
0x11ec   :  { %v2663_v3 = vadd.f32 %v2645_v60, %v2645_v60  ;;  %v2660_v8 = vadd.f32 %v3204_v62, %v2564_v28  ;;  %v2668_v5 = vsel %vm310_vm2, %v2664_v63, 0.0  ;;  %v2743_v28 = vpop.permute.xlu0 %2742 }
0x11ed   :  { %v2654_v61 = vpop.f32.mrf.mxu0 }
0x11ee   :  { %v2667_v4 = vsel %vm310_vm2, %v2663_v3, 0.0  ;;  %v2655_v16 = vadd.f32 %v2654_v61, %v2560_v58  ;;  %v2666_v20 = vadd.f32 %v2660_v8, %v2660_v8 }
0x11ef   :  { %v2669_v24 = vadd.f32 %v2668_v5, %v2667_v4 }
0x11f0   :  { %v2665_v18 = vadd.f32 %v2655_v16, %v2655_v16  ;;  %v2672_v0 = vsel %vm310_vm2, %v2666_v20, 0.0 }
0x11f2   :  { %v2670_v27 = vsel %vm310_vm2, %v2665_v18, 0.0 }
0x11f3   :  { %v2671_v29 = vadd.f32 %v2670_v27, %v2669_v24 }
0x11f5   :  { %v2673_v1 = vadd.f32 %v2672_v0, %v2671_v29 }
0x11f7   :  { %v2674_v33 = vrot.slane %v2673_v1, 4 }
0x11f9   :  { %v2675_v35 = vadd.f32 %v2674_v33, %v2673_v1 }
0x11fb   :  { %v2676_v59 = vrot.slane %v2675_v35, 2 }
0x11fd   :  { %v2677_v45 = vadd.f32 %v2676_v59, %v2675_v35 }
0x11ff   :  { %v2678_v25 = vrot.slane %v2677_v45, 1 }
0x1201   :  { %v2679_v13 = vadd.f32 %v2678_v25, %v2677_v45 }
0x1203   :  { %v2680_v37 = vmul.f32 0.03125, %v2679_v13 }
0x1205   :  { %v2682_v26 = vsub.f32 %v2664_v63, %v2680_v37  ;;  %v2683_v38 = vsub.f32 %v2665_v18, %v2680_v37  ;;  %v2684_v34 = vsub.f32 %v2666_v20, %v2680_v37  ;;  %v2681_v39 = vsub.f32 %v2663_v3, %v2680_v37 }
0x1207   :  { %v2685_v14 = vmul.f32 %v2681_v39, %v2681_v39  ;;  %v2686_v10 = vmul.f32 %v2682_v26, %v2682_v26  ;;  %v2687_v32 = vmul.f32 %v2683_v38, %v2683_v38  ;;  %v2688_v44 = vmul.f32 %v2684_v34, %v2684_v34 }
0x1209   :  { %v2689_v2 = vsel %vm310_vm2, %v2685_v14, 0.0  ;;  %v2690_v42 = vsel %vm310_vm2, %v2686_v10, 0.0  ;;  %v2692_v7 = vsel %vm310_vm2, %v2687_v32, 0.0  ;;  %v2694_v11 = vsel %vm310_vm2, %v2688_v44, 0.0 }
0x120a   :  { %v2691_v6 = vadd.f32 %v2690_v42, %v2689_v2 }
0x120c   :  { %v2693_v9 = vadd.f32 %v2692_v7, %v2691_v6 }
0x120e   :  { %v2695_v30 = vadd.f32 %v2694_v11, %v2693_v9 }
0x1210   :  { %v2696_v15 = vrot.slane %v2695_v30, 4 }
0x1212   :  { %v2697_v31 = vadd.f32 %v2696_v15, %v2695_v30 }
0x1214   :  { %v2698_v19 = vrot.slane %v2697_v31, 2 }
0x1216   :  { %v2699_v46 = vadd.f32 %v2698_v19, %v2697_v31 }
0x1218   :  { %v2700_v54 = vrot.slane %v2699_v46, 1 }
0x121a   :  { %v2701_v55 = vadd.f32 %v2700_v54, %v2699_v46 }
0x121c   :  { %v2702_v12 = vmul.f32 0.03125, %v2701_v55 }
0x121e   :  { %v2703_v52 = vadd.f32 1e-05, %v2702_v12 }
0x1220   :  { %3270 = vrsqrt.f32 %v2703_v52 }
0x122d   :  { %v3271_v43 = vpop.eup %3270 }
0x122e   :  { %v2705_v36 = vmul.f32 %v3271_v43, %v2681_v39  ;;  %v2707_v23 = vmul.f32 %v3271_v43, %v2683_v38  ;;  %v2708_v17 = vmul.f32 %v3271_v43, %v2684_v34  ;;  %v2706_v47 = vmul.f32 %v3271_v43, %v2682_v26 }
0x1230   :  { %v2725_v41 = vmul.f32 %v2711_v40, %v2705_v36  ;;  %v2727_v48 = vmul.f32 %v2719_v21, %v2707_v23  ;;  %v2728_v49 = vmul.f32 %v2723_v56, %v2708_v17  ;;  %v2726_v50 = vmul.f32 %v2715_v53, %v2706_v47 }
0x1232   :  { %v2746_v60 = vadd.f32 %v2735_v22, %v2726_v50  ;;  %v2745_v62 = vadd.f32 %v2731_v57, %v2725_v41  ;;  %v2747_v63 = vadd.f32 %v2739_v51, %v2727_v48  ;;  %v2748_v3 = vadd.f32 %v2743_v28, %v2728_v49 }
0x1234   :  { %2750 = vst.msk [vmem:[%s4074_s7 + $0x8] sm:$0xff] %vm310_vm2, %v2746_v60  ;;  %2749 = vst.msk [vmem:[%s4074_s7] sm:$0xff] %vm310_vm2, %v2745_v62 }
0x1235   :  { %2751 = vst.msk [vmem:[%s4074_s7 + $0x10] sm:$0xff] %vm310_vm2, %v2747_v63  ;;  %2752 = vst.msk [vmem:[%s4074_s7 + $0x18] sm:$0xff] %vm310_vm2, %v2748_v3 }

</bundles_post_ra>
